<compile_context>
chip_gen: v5e
topology: v5e:2x2
jax: 0.10.0
libtpu: 0.0.40
codegen_flags: <defaults>
</compile_context>

<pallas_src>
import functools

import jax
import jax.numpy as jnp
import numpy as np
from jax import lax
from jax.experimental import pallas as pl
from jax.experimental.pallas import tpu as pltpu


def _mha_kernel(q_ref, k_ref, v_ref,
                wq_ref, bq_ref, wk_ref, bk_ref, wv_ref, bv_ref,
                wo_ref, bo_ref,
                o_ref, *, batch_tile, seq, heads, d_k, mxu_dtype):
    """One grid step = `batch_tile` batch elements flattened to (batch_tile*seq, Dp)."""
    scale = jnp.float32(1.0 / np.sqrt(d_k))

    xq = q_ref[...]            # (rows, Dp), mxu_dtype
    xk = k_ref[...]
    xv = v_ref[...]
    wq = wq_ref[...]
    wk = wk_ref[...]
    wv = wv_ref[...]
    wo = wo_ref[...]
    bq = bq_ref[...]
    bk = bk_ref[...]
    bv = bv_ref[...]
    bo = bo_ref[...]

    # Linear projections on the MXU, f32 accumulation; fold 1/sqrt(d_k) into q once.
    qp = (jnp.dot(xq, wq, preferred_element_type=jnp.float32) + bq) * scale
    kp = jnp.dot(xk, wk, preferred_element_type=jnp.float32) + bk
    vp = jnp.dot(xv, wv, preferred_element_type=jnp.float32) + bv

    # Cast once per tensor (no-op when mxu_dtype is f32).
    qc = qp.astype(mxu_dtype)
    kc = kp.astype(mxu_dtype)
    vc = vp.astype(mxu_dtype)

    dp = wo.shape[1]
    for b in range(batch_tile):                      # small static trip count
        r0 = b * seq
        acc = jnp.zeros((seq, dp), jnp.float32)
        for h in range(heads):                       # small static trip count
            lo = h * d_k
            hi = lo + d_k
            qh = qc[r0:r0 + seq, lo:hi]              # (seq, d_k)
            kh = kc[r0:r0 + seq, lo:hi]
            vh = vc[r0:r0 + seq, lo:hi]

            # scores = qh @ kh^T without materializing a transpose.
            s = lax.dot_general(qh, kh, (((1,), (1,)), ((), ())),
                                preferred_element_type=jnp.float32)   # (seq, seq)
            # numerically stable softmax; reciprocal goes to the EUP.
            s = s - jnp.max(s, axis=-1, keepdims=True)
            e = jnp.exp(s)
            p = e * pl.reciprocal(jnp.sum(e, axis=-1, keepdims=True), approx=True)
            # TODO(synk): attention-prob dropout is identity in eval mode; not implemented.

            ctx = jnp.dot(p.astype(mxu_dtype), vh,
                          preferred_element_type=jnp.float32)          # (seq, d_k)
            # Fuse the output projection: no lane-axis concat of heads.
            acc = acc + jnp.dot(ctx.astype(mxu_dtype), wo[lo:hi, :],
                                preferred_element_type=jnp.float32)    # (seq, Dp)

        o_ref[r0:r0 + seq, :] = (acc + bo).astype(o_ref.dtype)


def _round_up(x, m):
    return (x + m - 1) // m * m


def _pick_batch_tile(batch, seq, target_rows=256):
    """Largest divisor of `batch` with bt*seq <= target_rows (keeps MXU M large
    while leaving >=2 parallel grid points for v7x's two TensorCores when batch
    is big)."""
    if seq >= target_rows:
        return 1
    best = 1
    for cand in range(1, batch + 1):
        if batch % cand == 0 and cand * seq <= target_rows:
            best = cand
    return best


def multi_head_attention(q, k, v, params, heads, *, mxu_dtype=jnp.float32):
    """q, k, v: (B, S, D).  params: PyTorch-style (out, in) weights + (D,) biases.

    mxu_dtype=jnp.bfloat16 casts activations/weights for the MXU (f32 accumulation)
    — the fast path on v6e/v7x.  Default f32 keeps tight numerics.
    """
    B, S, D = q.shape
    assert D % heads == 0, "d_model must be divisible by heads"
    d_k = D // heads
    out_dtype = q.dtype

    # Pad d_model up to a lane-dense multiple of 128 so all tiles/stores are unmasked.
    Dp = _round_up(D, 128)

    def prep_w(w):   # (out, in) -> (in, out), zero-padded to (Dp, Dp), MXU dtype
        wt = jnp.asarray(w).T
        wt = jnp.pad(wt, ((0, Dp - D), (0, Dp - D)))
        return wt.astype(mxu_dtype)

    def prep_b(b):   # (D,) -> (1, Dp) f32 row (biases stay f32 for the accumulator)
        return jnp.pad(jnp.asarray(b, jnp.float32), (0, Dp - D)).reshape(1, Dp)

    def prep_x(x):   # (B, S, D) -> (B*S, Dp), MXU dtype (layout plumbing in the wrapper)
        x2 = jnp.asarray(x).reshape(B * S, D)
        x2 = jnp.pad(x2, ((0, 0), (0, Dp - D)))
        return x2.astype(mxu_dtype)

    wq, wk, wv, wo = (prep_w(params[n]) for n in ("wq", "wk", "wv", "wo"))
    bq, bk, bv, bo = (prep_b(params[n]) for n in ("bq", "bk", "bv", "bo"))
    q2, k2, v2 = prep_x(q), prep_x(k), prep_x(v)

    bt = _pick_batch_tile(B, S)
    rows = bt * S                       # per-step matmul M dimension
    grid = (B // bt,)

    act_spec = pl.BlockSpec((rows, Dp), lambda i: (i, 0))
    # Weight/bias blocks are grid-invariant (same block index every step) -> DMA'd once.
    w_spec = pl.BlockSpec((Dp, Dp), lambda i: (0, 0))
    b_spec = pl.BlockSpec((1, Dp), lambda i: (0, 0))

    kernel = functools.partial(
        _mha_kernel, batch_tile=bt, seq=S, heads=heads, d_k=d_k, mxu_dtype=mxu_dtype)

    out2 = pl.pallas_call(
        kernel,
        out_shape=jax.ShapeDtypeStruct((B * S, Dp), out_dtype),
        grid_spec=pltpu.PrefetchScalarGridSpec(
            num_scalar_prefetch=0,
            grid=grid,
            in_specs=[act_spec, act_spec, act_spec,
                      w_spec, b_spec, w_spec, b_spec, w_spec, b_spec,
                      w_spec, b_spec],
            out_specs=pl.BlockSpec((rows, Dp), lambda i: (i, 0)),
        ),
        compiler_params=pltpu.CompilerParams(
            dimension_semantics=("parallel",)),
    )(q2, k2, v2, wq, bq, wk, bk, wv, bv, wo, bo)

    # Strip lane padding and restore (B, S, D) outside the kernel.
    return out2[:, :D].reshape(B, S, D)


def _reference_mha(q, k, v, params, heads):
    """Pure-JAX reference mirroring the PyTorch forward (mask=None, eval mode)."""
    B, S, D = q.shape
    d_k = D // heads

    def linear(x, w, b):  # w: (out, in)
        return x @ w.T + b

    qp = linear(q, params["wq"], params["bq"]).reshape(B, S, heads, d_k).transpose(0, 2, 1, 3)
    kp = linear(k, params["wk"], params["bk"]).reshape(B, S, heads, d_k).transpose(0, 2, 1, 3)
    vp = linear(v, params["wv"], params["bv"]).reshape(B, S, heads, d_k).transpose(0, 2, 1, 3)

    scores = jnp.einsum("bhqd,bhkd->bhqk", qp, kp) / jnp.sqrt(jnp.float32(d_k))
    scores = jax.nn.softmax(scores, axis=-1)
    out = jnp.einsum("bhqk,bhkd->bhqd", scores, vp)
    out = out.transpose(0, 2, 1, 3).reshape(B, S, D)
    return linear(out, params["wo"], params["bo"])


def _init_params(key, d_model):
    """Deterministic init mimicking nn.Linear: U(-1/sqrt(in), 1/sqrt(in))."""
    bound = 1.0 / np.sqrt(d_model)
    keys = jax.random.split(key, 8)

    def u(k, shape):
        return jax.random.uniform(k, shape, jnp.float32, -bound, bound)

    return {
        "wq": u(keys[0], (d_model, d_model)), "bq": u(keys[1], (d_model,)),
        "wk": u(keys[2], (d_model, d_model)), "bk": u(keys[3], (d_model,)),
        "wv": u(keys[4], (d_model, d_model)), "bv": u(keys[5], (d_model,)),
        "wo": u(keys[6], (d_model, d_model)), "bo": u(keys[7], (d_model,)),
    }


if __name__ == "__main__":
    B, S, D, HEADS = 2, 8, 32, 8

    root = jax.random.PRNGKey(0)
    k_params, k_q, k_k, k_v = jax.random.split(root, 4)

    params = _init_params(k_params, D)
    q = jax.random.normal(k_q, (B, S, D), jnp.float32)
    k = jax.random.normal(k_k, (B, S, D), jnp.float32)
    v = jax.random.normal(k_v, (B, S, D), jnp.float32)

    ref = _reference_mha(q, k, v, params, HEADS)

    # f32 MXU-input path.  Tolerance is 2e-3 (not 1e-5) because the softmax
    # denominator uses the EUP approximate reciprocal (~1e-4 relative).
    out = jax.block_until_ready(multi_head_attention(q, k, v, params, HEADS))
    np.testing.assert_allclose(np.asarray(out), np.asarray(ref), rtol=2e-3, atol=2e-3)

    # bf16 MXU-input path (v6e/v7x fast path): looser tolerance as flagged in review.
    out_bf16 = jax.block_until_ready(
        multi_head_attention(q, k, v, params, HEADS, mxu_dtype=jnp.bfloat16))
    np.testing.assert_allclose(np.asarray(out_bf16), np.asarray(ref), rtol=5e-2, atol=5e-2)

    print("KERNEL_OK")
</pallas_src>

<mosaic_0001>
module attributes {stable_mosaic.version = 11 : i64} {
  func.func @_mha_kernel(%arg0: i32, %arg1: memref<16x128xf32, #tpu.memory_space<vmem>>, %arg2: memref<16x128xf32, #tpu.memory_space<vmem>>, %arg3: memref<16x128xf32, #tpu.memory_space<vmem>>, %arg4: memref<128x128xf32, #tpu.memory_space<vmem>>, %arg5: memref<1x128xf32, #tpu.memory_space<vmem>>, %arg6: memref<128x128xf32, #tpu.memory_space<vmem>>, %arg7: memref<1x128xf32, #tpu.memory_space<vmem>>, %arg8: memref<128x128xf32, #tpu.memory_space<vmem>>, %arg9: memref<1x128xf32, #tpu.memory_space<vmem>>, %arg10: memref<128x128xf32, #tpu.memory_space<vmem>>, %arg11: memref<1x128xf32, #tpu.memory_space<vmem>>, %arg12: memref<16x128xf32, #tpu.memory_space<vmem>>) attributes {dimension_semantics = [#tpu.dimension_semantics<parallel>], iteration_bounds = array<i64: 1>, scalar_prefetch = 0 : i64, scratch_operands = 0 : i64, tpu.core_type = #tpu.core_type<tc>, window_params = [{transform_indices = @transform_0, window_bounds = array<i64: 16, 128>}, {transform_indices = @transform_1, window_bounds = array<i64: 16, 128>}, {transform_indices = @transform_2, window_bounds = array<i64: 16, 128>}, {pipeline_mode = #tpu.pipeline_mode<synchronous>, transform_indices = @transform_3, window_bounds = array<i64: 128, 128>}, {pipeline_mode = #tpu.pipeline_mode<synchronous>, transform_indices = @transform_4, window_bounds = array<i64: 1, 128>}, {pipeline_mode = #tpu.pipeline_mode<synchronous>, transform_indices = @transform_5, window_bounds = array<i64: 128, 128>}, {pipeline_mode = #tpu.pipeline_mode<synchronous>, transform_indices = @transform_6, window_bounds = array<i64: 1, 128>}, {pipeline_mode = #tpu.pipeline_mode<synchronous>, transform_indices = @transform_7, window_bounds = array<i64: 128, 128>}, {pipeline_mode = #tpu.pipeline_mode<synchronous>, transform_indices = @transform_8, window_bounds = array<i64: 1, 128>}, {pipeline_mode = #tpu.pipeline_mode<synchronous>, transform_indices = @transform_9, window_bounds = array<i64: 128, 128>}, {pipeline_mode = #tpu.pipeline_mode<synchronous>, transform_indices = @transform_10, window_bounds = array<i64: 1, 128>}, {transform_indices = @transform_11, window_bounds = array<i64: 16, 128>}]} {
    %c0 = arith.constant 0 : index
    %c0_0 = arith.constant 0 : index
    %0 = vector.load %arg1[%c0, %c0_0] : memref<16x128xf32, #tpu.memory_space<vmem>>, vector<16x128xf32>
    %c0_1 = arith.constant 0 : index
    %c0_2 = arith.constant 0 : index
    %1 = vector.load %arg2[%c0_1, %c0_2] : memref<16x128xf32, #tpu.memory_space<vmem>>, vector<16x128xf32>
    %c0_3 = arith.constant 0 : index
    %c0_4 = arith.constant 0 : index
    %2 = vector.load %arg3[%c0_3, %c0_4] : memref<16x128xf32, #tpu.memory_space<vmem>>, vector<16x128xf32>
    %c0_5 = arith.constant 0 : index
    %c0_6 = arith.constant 0 : index
    %3 = vector.load %arg4[%c0_5, %c0_6] : memref<128x128xf32, #tpu.memory_space<vmem>>, vector<128x128xf32>
    %c0_7 = arith.constant 0 : index
    %c0_8 = arith.constant 0 : index
    %4 = vector.load %arg6[%c0_7, %c0_8] : memref<128x128xf32, #tpu.memory_space<vmem>>, vector<128x128xf32>
    %c0_9 = arith.constant 0 : index
    %c0_10 = arith.constant 0 : index
    %5 = vector.load %arg8[%c0_9, %c0_10] : memref<128x128xf32, #tpu.memory_space<vmem>>, vector<128x128xf32>
    %c0_11 = arith.constant 0 : index
    %c0_12 = arith.constant 0 : index
    %6 = vector.load %arg10[%c0_11, %c0_12] : memref<128x128xf32, #tpu.memory_space<vmem>>, vector<128x128xf32>
    %c0_13 = arith.constant 0 : index
    %c0_14 = arith.constant 0 : index
    %7 = vector.load %arg5[%c0_13, %c0_14] : memref<1x128xf32, #tpu.memory_space<vmem>>, vector<1x128xf32>
    %c0_15 = arith.constant 0 : index
    %c0_16 = arith.constant 0 : index
    %8 = vector.load %arg7[%c0_15, %c0_16] : memref<1x128xf32, #tpu.memory_space<vmem>>, vector<1x128xf32>
    %c0_17 = arith.constant 0 : index
    %c0_18 = arith.constant 0 : index
    %9 = vector.load %arg9[%c0_17, %c0_18] : memref<1x128xf32, #tpu.memory_space<vmem>>, vector<1x128xf32>
    %c0_19 = arith.constant 0 : index
    %c0_20 = arith.constant 0 : index
    %10 = vector.load %arg11[%c0_19, %c0_20] : memref<1x128xf32, #tpu.memory_space<vmem>>, vector<1x128xf32>
    %cst = arith.constant dense<0.000000e+00> : vector<16x128xf32>
    %11 = tpu.matmul %0, %3, %cst {dimension_numbers = #tpu.dot_dimension_numbers<[1], [0], [0], [1], [0, 0, 1, 1], [], []>} : vector<16x128xf32>, vector<128x128xf32>, vector<16x128xf32> -> vector<16x128xf32>
    %12 = vector.broadcast %7 : vector<1x128xf32> to vector<16x128xf32>
    %13 = arith.addf %11, %12 : vector<16x128xf32>
    %cst_21 = arith.constant 5.000000e-01 : f32
    %14 = vector.broadcast %cst_21 : f32 to vector<16x128xf32>
    %15 = arith.mulf %13, %14 : vector<16x128xf32>
    %cst_22 = arith.constant dense<0.000000e+00> : vector<16x128xf32>
    %16 = tpu.matmul %1, %4, %cst_22 {dimension_numbers = #tpu.dot_dimension_numbers<[1], [0], [0], [1], [0, 0, 1, 1], [], []>} : vector<16x128xf32>, vector<128x128xf32>, vector<16x128xf32> -> vector<16x128xf32>
    %17 = vector.broadcast %8 : vector<1x128xf32> to vector<16x128xf32>
    %18 = arith.addf %16, %17 : vector<16x128xf32>
    %cst_23 = arith.constant dense<0.000000e+00> : vector<16x128xf32>
    %19 = tpu.matmul %2, %5, %cst_23 {dimension_numbers = #tpu.dot_dimension_numbers<[1], [0], [0], [1], [0, 0, 1, 1], [], []>} : vector<16x128xf32>, vector<128x128xf32>, vector<16x128xf32> -> vector<16x128xf32>
    %20 = vector.broadcast %9 : vector<1x128xf32> to vector<16x128xf32>
    %21 = arith.addf %19, %20 : vector<16x128xf32>
    %cst_24 = arith.constant 0.000000e+00 : f32
    %22 = vector.broadcast %cst_24 : f32 to vector<8x128xf32>
    %23 = vector.extract_strided_slice %15 {offsets = [0, 0], sizes = [8, 4], strides = [1, 1]} : vector<16x128xf32> to vector<8x4xf32>
    %24 = vector.extract_strided_slice %18 {offsets = [0, 0], sizes = [8, 4], strides = [1, 1]} : vector<16x128xf32> to vector<8x4xf32>
    %25 = vector.extract_strided_slice %21 {offsets = [0, 0], sizes = [8, 4], strides = [1, 1]} : vector<16x128xf32> to vector<8x4xf32>
    %cst_25 = arith.constant dense<0.000000e+00> : vector<8x8xf32>
    %26 = tpu.matmul %23, %24, %cst_25 {dimension_numbers = #tpu.dot_dimension_numbers<[1], [1], [0], [0], [0, 0, 1, 0], [], []>} : vector<8x4xf32>, vector<8x4xf32>, vector<8x8xf32> -> vector<8x8xf32>
    %cst_26 = arith.constant dense<0xFF800000> : vector<8xf32>
    %27 = vector.multi_reduction <maximumf>, %26, %cst_26 [1] : vector<8x8xf32> to vector<8xf32>
    %28 = vector.shape_cast %27 : vector<8xf32> to vector<8x1xf32>
    %29 = vector.broadcast %28 : vector<8x1xf32> to vector<8x8xf32>
    %30 = arith.subf %26, %29 : vector<8x8xf32>
    %31 = math.exp %30 : vector<8x8xf32>
    %cst_27 = arith.constant dense<0.000000e+00> : vector<8xf32>
    %32 = vector.multi_reduction <add>, %31, %cst_27 [1] : vector<8x8xf32> to vector<8xf32>
    %33 = vector.shape_cast %32 : vector<8xf32> to vector<8x1xf32>
    %34 = tpu.reciprocal %33 {approx = true} : vector<8x1xf32> -> vector<8x1xf32>
    %35 = vector.broadcast %34 : vector<8x1xf32> to vector<8x8xf32>
    %36 = arith.mulf %31, %35 : vector<8x8xf32>
    %cst_28 = arith.constant dense<0.000000e+00> : vector<8x4xf32>
    %37 = tpu.matmul %36, %25, %cst_28 {dimension_numbers = #tpu.dot_dimension_numbers<[1], [0], [0], [1], [0, 0, 1, 1], [], []>} : vector<8x8xf32>, vector<8x4xf32>, vector<8x4xf32> -> vector<8x4xf32>
    %38 = vector.extract_strided_slice %6 {offsets = [0, 0], sizes = [4, 128], strides = [1, 1]} : vector<128x128xf32> to vector<4x128xf32>
    %cst_29 = arith.constant dense<0.000000e+00> : vector<8x128xf32>
    %39 = tpu.matmul %37, %38, %cst_29 {dimension_numbers = #tpu.dot_dimension_numbers<[1], [0], [0], [1], [0, 0, 1, 1], [], []>} : vector<8x4xf32>, vector<4x128xf32>, vector<8x128xf32> -> vector<8x128xf32>
    %40 = arith.addf %22, %39 : vector<8x128xf32>
    %41 = vector.extract_strided_slice %15 {offsets = [0, 4], sizes = [8, 4], strides = [1, 1]} : vector<16x128xf32> to vector<8x4xf32>
    %42 = vector.extract_strided_slice %18 {offsets = [0, 4], sizes = [8, 4], strides = [1, 1]} : vector<16x128xf32> to vector<8x4xf32>
    %43 = vector.extract_strided_slice %21 {offsets = [0, 4], sizes = [8, 4], strides = [1, 1]} : vector<16x128xf32> to vector<8x4xf32>
    %cst_30 = arith.constant dense<0.000000e+00> : vector<8x8xf32>
    %44 = tpu.matmul %41, %42, %cst_30 {dimension_numbers = #tpu.dot_dimension_numbers<[1], [1], [0], [0], [0, 0, 1, 0], [], []>} : vector<8x4xf32>, vector<8x4xf32>, vector<8x8xf32> -> vector<8x8xf32>
    %cst_31 = arith.constant dense<0xFF800000> : vector<8xf32>
    %45 = vector.multi_reduction <maximumf>, %44, %cst_31 [1] : vector<8x8xf32> to vector<8xf32>
    %46 = vector.shape_cast %45 : vector<8xf32> to vector<8x1xf32>
    %47 = vector.broadcast %46 : vector<8x1xf32> to vector<8x8xf32>
    %48 = arith.subf %44, %47 : vector<8x8xf32>
    %49 = math.exp %48 : vector<8x8xf32>
    %cst_32 = arith.constant dense<0.000000e+00> : vector<8xf32>
    %50 = vector.multi_reduction <add>, %49, %cst_32 [1] : vector<8x8xf32> to vector<8xf32>
    %51 = vector.shape_cast %50 : vector<8xf32> to vector<8x1xf32>
    %52 = tpu.reciprocal %51 {approx = true} : vector<8x1xf32> -> vector<8x1xf32>
    %53 = vector.broadcast %52 : vector<8x1xf32> to vector<8x8xf32>
    %54 = arith.mulf %49, %53 : vector<8x8xf32>
    %cst_33 = arith.constant dense<0.000000e+00> : vector<8x4xf32>
    %55 = tpu.matmul %54, %43, %cst_33 {dimension_numbers = #tpu.dot_dimension_numbers<[1], [0], [0], [1], [0, 0, 1, 1], [], []>} : vector<8x8xf32>, vector<8x4xf32>, vector<8x4xf32> -> vector<8x4xf32>
    %56 = vector.extract_strided_slice %6 {offsets = [4, 0], sizes = [4, 128], strides = [1, 1]} : vector<128x128xf32> to vector<4x128xf32>
    %cst_34 = arith.constant dense<0.000000e+00> : vector<8x128xf32>
    %57 = tpu.matmul %55, %56, %cst_34 {dimension_numbers = #tpu.dot_dimension_numbers<[1], [0], [0], [1], [0, 0, 1, 1], [], []>} : vector<8x4xf32>, vector<4x128xf32>, vector<8x128xf32> -> vector<8x128xf32>
    %58 = arith.addf %40, %57 : vector<8x128xf32>
    %59 = vector.extract_strided_slice %15 {offsets = [0, 8], sizes = [8, 4], strides = [1, 1]} : vector<16x128xf32> to vector<8x4xf32>
    %60 = vector.extract_strided_slice %18 {offsets = [0, 8], sizes = [8, 4], strides = [1, 1]} : vector<16x128xf32> to vector<8x4xf32>
    %61 = vector.extract_strided_slice %21 {offsets = [0, 8], sizes = [8, 4], strides = [1, 1]} : vector<16x128xf32> to vector<8x4xf32>
    %cst_35 = arith.constant dense<0.000000e+00> : vector<8x8xf32>
    %62 = tpu.matmul %59, %60, %cst_35 {dimension_numbers = #tpu.dot_dimension_numbers<[1], [1], [0], [0], [0, 0, 1, 0], [], []>} : vector<8x4xf32>, vector<8x4xf32>, vector<8x8xf32> -> vector<8x8xf32>
    %cst_36 = arith.constant dense<0xFF800000> : vector<8xf32>
    %63 = vector.multi_reduction <maximumf>, %62, %cst_36 [1] : vector<8x8xf32> to vector<8xf32>
    %64 = vector.shape_cast %63 : vector<8xf32> to vector<8x1xf32>
    %65 = vector.broadcast %64 : vector<8x1xf32> to vector<8x8xf32>
    %66 = arith.subf %62, %65 : vector<8x8xf32>
    %67 = math.exp %66 : vector<8x8xf32>
    %cst_37 = arith.constant dense<0.000000e+00> : vector<8xf32>
    %68 = vector.multi_reduction <add>, %67, %cst_37 [1] : vector<8x8xf32> to vector<8xf32>
    %69 = vector.shape_cast %68 : vector<8xf32> to vector<8x1xf32>
    %70 = tpu.reciprocal %69 {approx = true} : vector<8x1xf32> -> vector<8x1xf32>
    %71 = vector.broadcast %70 : vector<8x1xf32> to vector<8x8xf32>
    %72 = arith.mulf %67, %71 : vector<8x8xf32>
    %cst_38 = arith.constant dense<0.000000e+00> : vector<8x4xf32>
    %73 = tpu.matmul %72, %61, %cst_38 {dimension_numbers = #tpu.dot_dimension_numbers<[1], [0], [0], [1], [0, 0, 1, 1], [], []>} : vector<8x8xf32>, vector<8x4xf32>, vector<8x4xf32> -> vector<8x4xf32>
    %74 = vector.extract_strided_slice %6 {offsets = [8, 0], sizes = [4, 128], strides = [1, 1]} : vector<128x128xf32> to vector<4x128xf32>
    %cst_39 = arith.constant dense<0.000000e+00> : vector<8x128xf32>
    %75 = tpu.matmul %73, %74, %cst_39 {dimension_numbers = #tpu.dot_dimension_numbers<[1], [0], [0], [1], [0, 0, 1, 1], [], []>} : vector<8x4xf32>, vector<4x128xf32>, vector<8x128xf32> -> vector<8x128xf32>
    %76 = arith.addf %58, %75 : vector<8x128xf32>
    %77 = vector.extract_strided_slice %15 {offsets = [0, 12], sizes = [8, 4], strides = [1, 1]} : vector<16x128xf32> to vector<8x4xf32>
    %78 = vector.extract_strided_slice %18 {offsets = [0, 12], sizes = [8, 4], strides = [1, 1]} : vector<16x128xf32> to vector<8x4xf32>
    %79 = vector.extract_strided_slice %21 {offsets = [0, 12], sizes = [8, 4], strides = [1, 1]} : vector<16x128xf32> to vector<8x4xf32>
    %cst_40 = arith.constant dense<0.000000e+00> : vector<8x8xf32>
    %80 = tpu.matmul %77, %78, %cst_40 {dimension_numbers = #tpu.dot_dimension_numbers<[1], [1], [0], [0], [0, 0, 1, 0], [], []>} : vector<8x4xf32>, vector<8x4xf32>, vector<8x8xf32> -> vector<8x8xf32>
    %cst_41 = arith.constant dense<0xFF800000> : vector<8xf32>
    %81 = vector.multi_reduction <maximumf>, %80, %cst_41 [1] : vector<8x8xf32> to vector<8xf32>
    %82 = vector.shape_cast %81 : vector<8xf32> to vector<8x1xf32>
    %83 = vector.broadcast %82 : vector<8x1xf32> to vector<8x8xf32>
    %84 = arith.subf %80, %83 : vector<8x8xf32>
    %85 = math.exp %84 : vector<8x8xf32>
    %cst_42 = arith.constant dense<0.000000e+00> : vector<8xf32>
    %86 = vector.multi_reduction <add>, %85, %cst_42 [1] : vector<8x8xf32> to vector<8xf32>
    %87 = vector.shape_cast %86 : vector<8xf32> to vector<8x1xf32>
    %88 = tpu.reciprocal %87 {approx = true} : vector<8x1xf32> -> vector<8x1xf32>
    %89 = vector.broadcast %88 : vector<8x1xf32> to vector<8x8xf32>
    %90 = arith.mulf %85, %89 : vector<8x8xf32>
    %cst_43 = arith.constant dense<0.000000e+00> : vector<8x4xf32>
    %91 = tpu.matmul %90, %79, %cst_43 {dimension_numbers = #tpu.dot_dimension_numbers<[1], [0], [0], [1], [0, 0, 1, 1], [], []>} : vector<8x8xf32>, vector<8x4xf32>, vector<8x4xf32> -> vector<8x4xf32>
    %92 = vector.extract_strided_slice %6 {offsets = [12, 0], sizes = [4, 128], strides = [1, 1]} : vector<128x128xf32> to vector<4x128xf32>
    %cst_44 = arith.constant dense<0.000000e+00> : vector<8x128xf32>
    %93 = tpu.matmul %91, %92, %cst_44 {dimension_numbers = #tpu.dot_dimension_numbers<[1], [0], [0], [1], [0, 0, 1, 1], [], []>} : vector<8x4xf32>, vector<4x128xf32>, vector<8x128xf32> -> vector<8x128xf32>
    %94 = arith.addf %76, %93 : vector<8x128xf32>
    %95 = vector.extract_strided_slice %15 {offsets = [0, 16], sizes = [8, 4], strides = [1, 1]} : vector<16x128xf32> to vector<8x4xf32>
    %96 = vector.extract_strided_slice %18 {offsets = [0, 16], sizes = [8, 4], strides = [1, 1]} : vector<16x128xf32> to vector<8x4xf32>
    %97 = vector.extract_strided_slice %21 {offsets = [0, 16], sizes = [8, 4], strides = [1, 1]} : vector<16x128xf32> to vector<8x4xf32>
    %cst_45 = arith.constant dense<0.000000e+00> : vector<8x8xf32>
    %98 = tpu.matmul %95, %96, %cst_45 {dimension_numbers = #tpu.dot_dimension_numbers<[1], [1], [0], [0], [0, 0, 1, 0], [], []>} : vector<8x4xf32>, vector<8x4xf32>, vector<8x8xf32> -> vector<8x8xf32>
    %cst_46 = arith.constant dense<0xFF800000> : vector<8xf32>
    %99 = vector.multi_reduction <maximumf>, %98, %cst_46 [1] : vector<8x8xf32> to vector<8xf32>
    %100 = vector.shape_cast %99 : vector<8xf32> to vector<8x1xf32>
    %101 = vector.broadcast %100 : vector<8x1xf32> to vector<8x8xf32>
    %102 = arith.subf %98, %101 : vector<8x8xf32>
    %103 = math.exp %102 : vector<8x8xf32>
    %cst_47 = arith.constant dense<0.000000e+00> : vector<8xf32>
    %104 = vector.multi_reduction <add>, %103, %cst_47 [1] : vector<8x8xf32> to vector<8xf32>
    %105 = vector.shape_cast %104 : vector<8xf32> to vector<8x1xf32>
    %106 = tpu.reciprocal %105 {approx = true} : vector<8x1xf32> -> vector<8x1xf32>
    %107 = vector.broadcast %106 : vector<8x1xf32> to vector<8x8xf32>
    %108 = arith.mulf %103, %107 : vector<8x8xf32>
    %cst_48 = arith.constant dense<0.000000e+00> : vector<8x4xf32>
    %109 = tpu.matmul %108, %97, %cst_48 {dimension_numbers = #tpu.dot_dimension_numbers<[1], [0], [0], [1], [0, 0, 1, 1], [], []>} : vector<8x8xf32>, vector<8x4xf32>, vector<8x4xf32> -> vector<8x4xf32>
    %110 = vector.extract_strided_slice %6 {offsets = [16, 0], sizes = [4, 128], strides = [1, 1]} : vector<128x128xf32> to vector<4x128xf32>
    %cst_49 = arith.constant dense<0.000000e+00> : vector<8x128xf32>
    %111 = tpu.matmul %109, %110, %cst_49 {dimension_numbers = #tpu.dot_dimension_numbers<[1], [0], [0], [1], [0, 0, 1, 1], [], []>} : vector<8x4xf32>, vector<4x128xf32>, vector<8x128xf32> -> vector<8x128xf32>
    %112 = arith.addf %94, %111 : vector<8x128xf32>
    %113 = vector.extract_strided_slice %15 {offsets = [0, 20], sizes = [8, 4], strides = [1, 1]} : vector<16x128xf32> to vector<8x4xf32>
    %114 = vector.extract_strided_slice %18 {offsets = [0, 20], sizes = [8, 4], strides = [1, 1]} : vector<16x128xf32> to vector<8x4xf32>
    %115 = vector.extract_strided_slice %21 {offsets = [0, 20], sizes = [8, 4], strides = [1, 1]} : vector<16x128xf32> to vector<8x4xf32>
    %cst_50 = arith.constant dense<0.000000e+00> : vector<8x8xf32>
    %116 = tpu.matmul %113, %114, %cst_50 {dimension_numbers = #tpu.dot_dimension_numbers<[1], [1], [0], [0], [0, 0, 1, 0], [], []>} : vector<8x4xf32>, vector<8x4xf32>, vector<8x8xf32> -> vector<8x8xf32>
    %cst_51 = arith.constant dense<0xFF800000> : vector<8xf32>
    %117 = vector.multi_reduction <maximumf>, %116, %cst_51 [1] : vector<8x8xf32> to vector<8xf32>
    %118 = vector.shape_cast %117 : vector<8xf32> to vector<8x1xf32>
    %119 = vector.broadcast %118 : vector<8x1xf32> to vector<8x8xf32>
    %120 = arith.subf %116, %119 : vector<8x8xf32>
    %121 = math.exp %120 : vector<8x8xf32>
    %cst_52 = arith.constant dense<0.000000e+00> : vector<8xf32>
    %122 = vector.multi_reduction <add>, %121, %cst_52 [1] : vector<8x8xf32> to vector<8xf32>
    %123 = vector.shape_cast %122 : vector<8xf32> to vector<8x1xf32>
    %124 = tpu.reciprocal %123 {approx = true} : vector<8x1xf32> -> vector<8x1xf32>
    %125 = vector.broadcast %124 : vector<8x1xf32> to vector<8x8xf32>
    %126 = arith.mulf %121, %125 : vector<8x8xf32>
    %cst_53 = arith.constant dense<0.000000e+00> : vector<8x4xf32>
    %127 = tpu.matmul %126, %115, %cst_53 {dimension_numbers = #tpu.dot_dimension_numbers<[1], [0], [0], [1], [0, 0, 1, 1], [], []>} : vector<8x8xf32>, vector<8x4xf32>, vector<8x4xf32> -> vector<8x4xf32>
    %128 = vector.extract_strided_slice %6 {offsets = [20, 0], sizes = [4, 128], strides = [1, 1]} : vector<128x128xf32> to vector<4x128xf32>
    %cst_54 = arith.constant dense<0.000000e+00> : vector<8x128xf32>
    %129 = tpu.matmul %127, %128, %cst_54 {dimension_numbers = #tpu.dot_dimension_numbers<[1], [0], [0], [1], [0, 0, 1, 1], [], []>} : vector<8x4xf32>, vector<4x128xf32>, vector<8x128xf32> -> vector<8x128xf32>
    %130 = arith.addf %112, %129 : vector<8x128xf32>
    %131 = vector.extract_strided_slice %15 {offsets = [0, 24], sizes = [8, 4], strides = [1, 1]} : vector<16x128xf32> to vector<8x4xf32>
    %132 = vector.extract_strided_slice %18 {offsets = [0, 24], sizes = [8, 4], strides = [1, 1]} : vector<16x128xf32> to vector<8x4xf32>
    %133 = vector.extract_strided_slice %21 {offsets = [0, 24], sizes = [8, 4], strides = [1, 1]} : vector<16x128xf32> to vector<8x4xf32>
    %cst_55 = arith.constant dense<0.000000e+00> : vector<8x8xf32>
    %134 = tpu.matmul %131, %132, %cst_55 {dimension_numbers = #tpu.dot_dimension_numbers<[1], [1], [0], [0], [0, 0, 1, 0], [], []>} : vector<8x4xf32>, vector<8x4xf32>, vector<8x8xf32> -> vector<8x8xf32>
    %cst_56 = arith.constant dense<0xFF800000> : vector<8xf32>
    %135 = vector.multi_reduction <maximumf>, %134, %cst_56 [1] : vector<8x8xf32> to vector<8xf32>
    %136 = vector.shape_cast %135 : vector<8xf32> to vector<8x1xf32>
    %137 = vector.broadcast %136 : vector<8x1xf32> to vector<8x8xf32>
    %138 = arith.subf %134, %137 : vector<8x8xf32>
    %139 = math.exp %138 : vector<8x8xf32>
    %cst_57 = arith.constant dense<0.000000e+00> : vector<8xf32>
    %140 = vector.multi_reduction <add>, %139, %cst_57 [1] : vector<8x8xf32> to vector<8xf32>
    %141 = vector.shape_cast %140 : vector<8xf32> to vector<8x1xf32>
    %142 = tpu.reciprocal %141 {approx = true} : vector<8x1xf32> -> vector<8x1xf32>
    %143 = vector.broadcast %142 : vector<8x1xf32> to vector<8x8xf32>
    %144 = arith.mulf %139, %143 : vector<8x8xf32>
    %cst_58 = arith.constant dense<0.000000e+00> : vector<8x4xf32>
    %145 = tpu.matmul %144, %133, %cst_58 {dimension_numbers = #tpu.dot_dimension_numbers<[1], [0], [0], [1], [0, 0, 1, 1], [], []>} : vector<8x8xf32>, vector<8x4xf32>, vector<8x4xf32> -> vector<8x4xf32>
    %146 = vector.extract_strided_slice %6 {offsets = [24, 0], sizes = [4, 128], strides = [1, 1]} : vector<128x128xf32> to vector<4x128xf32>
    %cst_59 = arith.constant dense<0.000000e+00> : vector<8x128xf32>
    %147 = tpu.matmul %145, %146, %cst_59 {dimension_numbers = #tpu.dot_dimension_numbers<[1], [0], [0], [1], [0, 0, 1, 1], [], []>} : vector<8x4xf32>, vector<4x128xf32>, vector<8x128xf32> -> vector<8x128xf32>
    %148 = arith.addf %130, %147 : vector<8x128xf32>
    %149 = vector.extract_strided_slice %15 {offsets = [0, 28], sizes = [8, 4], strides = [1, 1]} : vector<16x128xf32> to vector<8x4xf32>
    %150 = vector.extract_strided_slice %18 {offsets = [0, 28], sizes = [8, 4], strides = [1, 1]} : vector<16x128xf32> to vector<8x4xf32>
    %151 = vector.extract_strided_slice %21 {offsets = [0, 28], sizes = [8, 4], strides = [1, 1]} : vector<16x128xf32> to vector<8x4xf32>
    %cst_60 = arith.constant dense<0.000000e+00> : vector<8x8xf32>
    %152 = tpu.matmul %149, %150, %cst_60 {dimension_numbers = #tpu.dot_dimension_numbers<[1], [1], [0], [0], [0, 0, 1, 0], [], []>} : vector<8x4xf32>, vector<8x4xf32>, vector<8x8xf32> -> vector<8x8xf32>
    %cst_61 = arith.constant dense<0xFF800000> : vector<8xf32>
    %153 = vector.multi_reduction <maximumf>, %152, %cst_61 [1] : vector<8x8xf32> to vector<8xf32>
    %154 = vector.shape_cast %153 : vector<8xf32> to vector<8x1xf32>
    %155 = vector.broadcast %154 : vector<8x1xf32> to vector<8x8xf32>
    %156 = arith.subf %152, %155 : vector<8x8xf32>
    %157 = math.exp %156 : vector<8x8xf32>
    %cst_62 = arith.constant dense<0.000000e+00> : vector<8xf32>
    %158 = vector.multi_reduction <add>, %157, %cst_62 [1] : vector<8x8xf32> to vector<8xf32>
    %159 = vector.shape_cast %158 : vector<8xf32> to vector<8x1xf32>
    %160 = tpu.reciprocal %159 {approx = true} : vector<8x1xf32> -> vector<8x1xf32>
    %161 = vector.broadcast %160 : vector<8x1xf32> to vector<8x8xf32>
    %162 = arith.mulf %157, %161 : vector<8x8xf32>
    %cst_63 = arith.constant dense<0.000000e+00> : vector<8x4xf32>
    %163 = tpu.matmul %162, %151, %cst_63 {dimension_numbers = #tpu.dot_dimension_numbers<[1], [0], [0], [1], [0, 0, 1, 1], [], []>} : vector<8x8xf32>, vector<8x4xf32>, vector<8x4xf32> -> vector<8x4xf32>
    %164 = vector.extract_strided_slice %6 {offsets = [28, 0], sizes = [4, 128], strides = [1, 1]} : vector<128x128xf32> to vector<4x128xf32>
    %cst_64 = arith.constant dense<0.000000e+00> : vector<8x128xf32>
    %165 = tpu.matmul %163, %164, %cst_64 {dimension_numbers = #tpu.dot_dimension_numbers<[1], [0], [0], [1], [0, 0, 1, 1], [], []>} : vector<8x4xf32>, vector<4x128xf32>, vector<8x128xf32> -> vector<8x128xf32>
    %166 = arith.addf %148, %165 : vector<8x128xf32>
    %167 = vector.broadcast %10 : vector<1x128xf32> to vector<8x128xf32>
    %168 = arith.addf %166, %167 : vector<8x128xf32>
    %c0_65 = arith.constant 0 : index
    %c0_66 = arith.constant 0 : index
    %169 = vector.load %arg12[%c0_65, %c0_66] : memref<16x128xf32, #tpu.memory_space<vmem>>, vector<8x128xf32>
    tpu.vector_store %arg12[%c0_65, %c0_66], %168 {strides = array<i32>} : memref<16x128xf32, #tpu.memory_space<vmem>>, vector<8x128xf32>,
    %cst_67 = arith.constant 0.000000e+00 : f32
    %170 = vector.broadcast %cst_67 : f32 to vector<8x128xf32>
    %171 = vector.extract_strided_slice %15 {offsets = [8, 0], sizes = [8, 4], strides = [1, 1]} : vector<16x128xf32> to vector<8x4xf32>
    %172 = vector.extract_strided_slice %18 {offsets = [8, 0], sizes = [8, 4], strides = [1, 1]} : vector<16x128xf32> to vector<8x4xf32>
    %173 = vector.extract_strided_slice %21 {offsets = [8, 0], sizes = [8, 4], strides = [1, 1]} : vector<16x128xf32> to vector<8x4xf32>
    %cst_68 = arith.constant dense<0.000000e+00> : vector<8x8xf32>
    %174 = tpu.matmul %171, %172, %cst_68 {dimension_numbers = #tpu.dot_dimension_numbers<[1], [1], [0], [0], [0, 0, 1, 0], [], []>} : vector<8x4xf32>, vector<8x4xf32>, vector<8x8xf32> -> vector<8x8xf32>
    %cst_69 = arith.constant dense<0xFF800000> : vector<8xf32>
    %175 = vector.multi_reduction <maximumf>, %174, %cst_69 [1] : vector<8x8xf32> to vector<8xf32>
    %176 = vector.shape_cast %175 : vector<8xf32> to vector<8x1xf32>
    %177 = vector.broadcast %176 : vector<8x1xf32> to vector<8x8xf32>
    %178 = arith.subf %174, %177 : vector<8x8xf32>
    %179 = math.exp %178 : vector<8x8xf32>
    %cst_70 = arith.constant dense<0.000000e+00> : vector<8xf32>
    %180 = vector.multi_reduction <add>, %179, %cst_70 [1] : vector<8x8xf32> to vector<8xf32>
    %181 = vector.shape_cast %180 : vector<8xf32> to vector<8x1xf32>
    %182 = tpu.reciprocal %181 {approx = true} : vector<8x1xf32> -> vector<8x1xf32>
    %183 = vector.broadcast %182 : vector<8x1xf32> to vector<8x8xf32>
    %184 = arith.mulf %179, %183 : vector<8x8xf32>
    %cst_71 = arith.constant dense<0.000000e+00> : vector<8x4xf32>
    %185 = tpu.matmul %184, %173, %cst_71 {dimension_numbers = #tpu.dot_dimension_numbers<[1], [0], [0], [1], [0, 0, 1, 1], [], []>} : vector<8x8xf32>, vector<8x4xf32>, vector<8x4xf32> -> vector<8x4xf32>
    %186 = vector.extract_strided_slice %6 {offsets = [0, 0], sizes = [4, 128], strides = [1, 1]} : vector<128x128xf32> to vector<4x128xf32>
    %cst_72 = arith.constant dense<0.000000e+00> : vector<8x128xf32>
    %187 = tpu.matmul %185, %186, %cst_72 {dimension_numbers = #tpu.dot_dimension_numbers<[1], [0], [0], [1], [0, 0, 1, 1], [], []>} : vector<8x4xf32>, vector<4x128xf32>, vector<8x128xf32> -> vector<8x128xf32>
    %188 = arith.addf %170, %187 : vector<8x128xf32>
    %189 = vector.extract_strided_slice %15 {offsets = [8, 4], sizes = [8, 4], strides = [1, 1]} : vector<16x128xf32> to vector<8x4xf32>
    %190 = vector.extract_strided_slice %18 {offsets = [8, 4], sizes = [8, 4], strides = [1, 1]} : vector<16x128xf32> to vector<8x4xf32>
    %191 = vector.extract_strided_slice %21 {offsets = [8, 4], sizes = [8, 4], strides = [1, 1]} : vector<16x128xf32> to vector<8x4xf32>
    %cst_73 = arith.constant dense<0.000000e+00> : vector<8x8xf32>
    %192 = tpu.matmul %189, %190, %cst_73 {dimension_numbers = #tpu.dot_dimension_numbers<[1], [1], [0], [0], [0, 0, 1, 0], [], []>} : vector<8x4xf32>, vector<8x4xf32>, vector<8x8xf32> -> vector<8x8xf32>
    %cst_74 = arith.constant dense<0xFF800000> : vector<8xf32>
    %193 = vector.multi_reduction <maximumf>, %192, %cst_74 [1] : vector<8x8xf32> to vector<8xf32>
    %194 = vector.shape_cast %193 : vector<8xf32> to vector<8x1xf32>
    %195 = vector.broadcast %194 : vector<8x1xf32> to vector<8x8xf32>
    %196 = arith.subf %192, %195 : vector<8x8xf32>
    %197 = math.exp %196 : vector<8x8xf32>
    %cst_75 = arith.constant dense<0.000000e+00> : vector<8xf32>
    %198 = vector.multi_reduction <add>, %197, %cst_75 [1] : vector<8x8xf32> to vector<8xf32>
    %199 = vector.shape_cast %198 : vector<8xf32> to vector<8x1xf32>
    %200 = tpu.reciprocal %199 {approx = true} : vector<8x1xf32> -> vector<8x1xf32>
    %201 = vector.broadcast %200 : vector<8x1xf32> to vector<8x8xf32>
    %202 = arith.mulf %197, %201 : vector<8x8xf32>
    %cst_76 = arith.constant dense<0.000000e+00> : vector<8x4xf32>
    %203 = tpu.matmul %202, %191, %cst_76 {dimension_numbers = #tpu.dot_dimension_numbers<[1], [0], [0], [1], [0, 0, 1, 1], [], []>} : vector<8x8xf32>, vector<8x4xf32>, vector<8x4xf32> -> vector<8x4xf32>
    %204 = vector.extract_strided_slice %6 {offsets = [4, 0], sizes = [4, 128], strides = [1, 1]} : vector<128x128xf32> to vector<4x128xf32>
    %cst_77 = arith.constant dense<0.000000e+00> : vector<8x128xf32>
    %205 = tpu.matmul %203, %204, %cst_77 {dimension_numbers = #tpu.dot_dimension_numbers<[1], [0], [0], [1], [0, 0, 1, 1], [], []>} : vector<8x4xf32>, vector<4x128xf32>, vector<8x128xf32> -> vector<8x128xf32>
    %206 = arith.addf %188, %205 : vector<8x128xf32>
    %207 = vector.extract_strided_slice %15 {offsets = [8, 8], sizes = [8, 4], strides = [1, 1]} : vector<16x128xf32> to vector<8x4xf32>
    %208 = vector.extract_strided_slice %18 {offsets = [8, 8], sizes = [8, 4], strides = [1, 1]} : vector<16x128xf32> to vector<8x4xf32>
    %209 = vector.extract_strided_slice %21 {offsets = [8, 8], sizes = [8, 4], strides = [1, 1]} : vector<16x128xf32> to vector<8x4xf32>
    %cst_78 = arith.constant dense<0.000000e+00> : vector<8x8xf32>
    %210 = tpu.matmul %207, %208, %cst_78 {dimension_numbers = #tpu.dot_dimension_numbers<[1], [1], [0], [0], [0, 0, 1, 0], [], []>} : vector<8x4xf32>, vector<8x4xf32>, vector<8x8xf32> -> vector<8x8xf32>
    %cst_79 = arith.constant dense<0xFF800000> : vector<8xf32>
    %211 = vector.multi_reduction <maximumf>, %210, %cst_79 [1] : vector<8x8xf32> to vector<8xf32>
    %212 = vector.shape_cast %211 : vector<8xf32> to vector<8x1xf32>
    %213 = vector.broadcast %212 : vector<8x1xf32> to vector<8x8xf32>
    %214 = arith.subf %210, %213 : vector<8x8xf32>
    %215 = math.exp %214 : vector<8x8xf32>
    %cst_80 = arith.constant dense<0.000000e+00> : vector<8xf32>
    %216 = vector.multi_reduction <add>, %215, %cst_80 [1] : vector<8x8xf32> to vector<8xf32>
    %217 = vector.shape_cast %216 : vector<8xf32> to vector<8x1xf32>
    %218 = tpu.reciprocal %217 {approx = true} : vector<8x1xf32> -> vector<8x1xf32>
    %219 = vector.broadcast %218 : vector<8x1xf32> to vector<8x8xf32>
    %220 = arith.mulf %215, %219 : vector<8x8xf32>
    %cst_81 = arith.constant dense<0.000000e+00> : vector<8x4xf32>
    %221 = tpu.matmul %220, %209, %cst_81 {dimension_numbers = #tpu.dot_dimension_numbers<[1], [0], [0], [1], [0, 0, 1, 1], [], []>} : vector<8x8xf32>, vector<8x4xf32>, vector<8x4xf32> -> vector<8x4xf32>
    %222 = vector.extract_strided_slice %6 {offsets = [8, 0], sizes = [4, 128], strides = [1, 1]} : vector<128x128xf32> to vector<4x128xf32>
    %cst_82 = arith.constant dense<0.000000e+00> : vector<8x128xf32>
    %223 = tpu.matmul %221, %222, %cst_82 {dimension_numbers = #tpu.dot_dimension_numbers<[1], [0], [0], [1], [0, 0, 1, 1], [], []>} : vector<8x4xf32>, vector<4x128xf32>, vector<8x128xf32> -> vector<8x128xf32>
    %224 = arith.addf %206, %223 : vector<8x128xf32>
    %225 = vector.extract_strided_slice %15 {offsets = [8, 12], sizes = [8, 4], strides = [1, 1]} : vector<16x128xf32> to vector<8x4xf32>
    %226 = vector.extract_strided_slice %18 {offsets = [8, 12], sizes = [8, 4], strides = [1, 1]} : vector<16x128xf32> to vector<8x4xf32>
    %227 = vector.extract_strided_slice %21 {offsets = [8, 12], sizes = [8, 4], strides = [1, 1]} : vector<16x128xf32> to vector<8x4xf32>
    %cst_83 = arith.constant dense<0.000000e+00> : vector<8x8xf32>
    %228 = tpu.matmul %225, %226, %cst_83 {dimension_numbers = #tpu.dot_dimension_numbers<[1], [1], [0], [0], [0, 0, 1, 0], [], []>} : vector<8x4xf32>, vector<8x4xf32>, vector<8x8xf32> -> vector<8x8xf32>
    %cst_84 = arith.constant dense<0xFF800000> : vector<8xf32>
    %229 = vector.multi_reduction <maximumf>, %228, %cst_84 [1] : vector<8x8xf32> to vector<8xf32>
    %230 = vector.shape_cast %229 : vector<8xf32> to vector<8x1xf32>
    %231 = vector.broadcast %230 : vector<8x1xf32> to vector<8x8xf32>
    %232 = arith.subf %228, %231 : vector<8x8xf32>
    %233 = math.exp %232 : vector<8x8xf32>
    %cst_85 = arith.constant dense<0.000000e+00> : vector<8xf32>
    %234 = vector.multi_reduction <add>, %233, %cst_85 [1] : vector<8x8xf32> to vector<8xf32>
    %235 = vector.shape_cast %234 : vector<8xf32> to vector<8x1xf32>
    %236 = tpu.reciprocal %235 {approx = true} : vector<8x1xf32> -> vector<8x1xf32>
    %237 = vector.broadcast %236 : vector<8x1xf32> to vector<8x8xf32>
    %238 = arith.mulf %233, %237 : vector<8x8xf32>
    %cst_86 = arith.constant dense<0.000000e+00> : vector<8x4xf32>
    %239 = tpu.matmul %238, %227, %cst_86 {dimension_numbers = #tpu.dot_dimension_numbers<[1], [0], [0], [1], [0, 0, 1, 1], [], []>} : vector<8x8xf32>, vector<8x4xf32>, vector<8x4xf32> -> vector<8x4xf32>
    %240 = vector.extract_strided_slice %6 {offsets = [12, 0], sizes = [4, 128], strides = [1, 1]} : vector<128x128xf32> to vector<4x128xf32>
    %cst_87 = arith.constant dense<0.000000e+00> : vector<8x128xf32>
    %241 = tpu.matmul %239, %240, %cst_87 {dimension_numbers = #tpu.dot_dimension_numbers<[1], [0], [0], [1], [0, 0, 1, 1], [], []>} : vector<8x4xf32>, vector<4x128xf32>, vector<8x128xf32> -> vector<8x128xf32>
    %242 = arith.addf %224, %241 : vector<8x128xf32>
    %243 = vector.extract_strided_slice %15 {offsets = [8, 16], sizes = [8, 4], strides = [1, 1]} : vector<16x128xf32> to vector<8x4xf32>
    %244 = vector.extract_strided_slice %18 {offsets = [8, 16], sizes = [8, 4], strides = [1, 1]} : vector<16x128xf32> to vector<8x4xf32>
    %245 = vector.extract_strided_slice %21 {offsets = [8, 16], sizes = [8, 4], strides = [1, 1]} : vector<16x128xf32> to vector<8x4xf32>
    %cst_88 = arith.constant dense<0.000000e+00> : vector<8x8xf32>
    %246 = tpu.matmul %243, %244, %cst_88 {dimension_numbers = #tpu.dot_dimension_numbers<[1], [1], [0], [0], [0, 0, 1, 0], [], []>} : vector<8x4xf32>, vector<8x4xf32>, vector<8x8xf32> -> vector<8x8xf32>
    %cst_89 = arith.constant dense<0xFF800000> : vector<8xf32>
    %247 = vector.multi_reduction <maximumf>, %246, %cst_89 [1] : vector<8x8xf32> to vector<8xf32>
    %248 = vector.shape_cast %247 : vector<8xf32> to vector<8x1xf32>
    %249 = vector.broadcast %248 : vector<8x1xf32> to vector<8x8xf32>
    %250 = arith.subf %246, %249 : vector<8x8xf32>
    %251 = math.exp %250 : vector<8x8xf32>
    %cst_90 = arith.constant dense<0.000000e+00> : vector<8xf32>
    %252 = vector.multi_reduction <add>, %251, %cst_90 [1] : vector<8x8xf32> to vector<8xf32>
    %253 = vector.shape_cast %252 : vector<8xf32> to vector<8x1xf32>
    %254 = tpu.reciprocal %253 {approx = true} : vector<8x1xf32> -> vector<8x1xf32>
    %255 = vector.broadcast %254 : vector<8x1xf32> to vector<8x8xf32>
    %256 = arith.mulf %251, %255 : vector<8x8xf32>
    %cst_91 = arith.constant dense<0.000000e+00> : vector<8x4xf32>
    %257 = tpu.matmul %256, %245, %cst_91 {dimension_numbers = #tpu.dot_dimension_numbers<[1], [0], [0], [1], [0, 0, 1, 1], [], []>} : vector<8x8xf32>, vector<8x4xf32>, vector<8x4xf32> -> vector<8x4xf32>
    %258 = vector.extract_strided_slice %6 {offsets = [16, 0], sizes = [4, 128], strides = [1, 1]} : vector<128x128xf32> to vector<4x128xf32>
    %cst_92 = arith.constant dense<0.000000e+00> : vector<8x128xf32>
    %259 = tpu.matmul %257, %258, %cst_92 {dimension_numbers = #tpu.dot_dimension_numbers<[1], [0], [0], [1], [0, 0, 1, 1], [], []>} : vector<8x4xf32>, vector<4x128xf32>, vector<8x128xf32> -> vector<8x128xf32>
    %260 = arith.addf %242, %259 : vector<8x128xf32>
    %261 = vector.extract_strided_slice %15 {offsets = [8, 20], sizes = [8, 4], strides = [1, 1]} : vector<16x128xf32> to vector<8x4xf32>
    %262 = vector.extract_strided_slice %18 {offsets = [8, 20], sizes = [8, 4], strides = [1, 1]} : vector<16x128xf32> to vector<8x4xf32>
    %263 = vector.extract_strided_slice %21 {offsets = [8, 20], sizes = [8, 4], strides = [1, 1]} : vector<16x128xf32> to vector<8x4xf32>
    %cst_93 = arith.constant dense<0.000000e+00> : vector<8x8xf32>
    %264 = tpu.matmul %261, %262, %cst_93 {dimension_numbers = #tpu.dot_dimension_numbers<[1], [1], [0], [0], [0, 0, 1, 0], [], []>} : vector<8x4xf32>, vector<8x4xf32>, vector<8x8xf32> -> vector<8x8xf32>
    %cst_94 = arith.constant dense<0xFF800000> : vector<8xf32>
    %265 = vector.multi_reduction <maximumf>, %264, %cst_94 [1] : vector<8x8xf32> to vector<8xf32>
    %266 = vector.shape_cast %265 : vector<8xf32> to vector<8x1xf32>
    %267 = vector.broadcast %266 : vector<8x1xf32> to vector<8x8xf32>
    %268 = arith.subf %264, %267 : vector<8x8xf32>
    %269 = math.exp %268 : vector<8x8xf32>
    %cst_95 = arith.constant dense<0.000000e+00> : vector<8xf32>
    %270 = vector.multi_reduction <add>, %269, %cst_95 [1] : vector<8x8xf32> to vector<8xf32>
    %271 = vector.shape_cast %270 : vector<8xf32> to vector<8x1xf32>
    %272 = tpu.reciprocal %271 {approx = true} : vector<8x1xf32> -> vector<8x1xf32>
    %273 = vector.broadcast %272 : vector<8x1xf32> to vector<8x8xf32>
    %274 = arith.mulf %269, %273 : vector<8x8xf32>
    %cst_96 = arith.constant dense<0.000000e+00> : vector<8x4xf32>
    %275 = tpu.matmul %274, %263, %cst_96 {dimension_numbers = #tpu.dot_dimension_numbers<[1], [0], [0], [1], [0, 0, 1, 1], [], []>} : vector<8x8xf32>, vector<8x4xf32>, vector<8x4xf32> -> vector<8x4xf32>
    %276 = vector.extract_strided_slice %6 {offsets = [20, 0], sizes = [4, 128], strides = [1, 1]} : vector<128x128xf32> to vector<4x128xf32>
    %cst_97 = arith.constant dense<0.000000e+00> : vector<8x128xf32>
    %277 = tpu.matmul %275, %276, %cst_97 {dimension_numbers = #tpu.dot_dimension_numbers<[1], [0], [0], [1], [0, 0, 1, 1], [], []>} : vector<8x4xf32>, vector<4x128xf32>, vector<8x128xf32> -> vector<8x128xf32>
    %278 = arith.addf %260, %277 : vector<8x128xf32>
    %279 = vector.extract_strided_slice %15 {offsets = [8, 24], sizes = [8, 4], strides = [1, 1]} : vector<16x128xf32> to vector<8x4xf32>
    %280 = vector.extract_strided_slice %18 {offsets = [8, 24], sizes = [8, 4], strides = [1, 1]} : vector<16x128xf32> to vector<8x4xf32>
    %281 = vector.extract_strided_slice %21 {offsets = [8, 24], sizes = [8, 4], strides = [1, 1]} : vector<16x128xf32> to vector<8x4xf32>
    %cst_98 = arith.constant dense<0.000000e+00> : vector<8x8xf32>
    %282 = tpu.matmul %279, %280, %cst_98 {dimension_numbers = #tpu.dot_dimension_numbers<[1], [1], [0], [0], [0, 0, 1, 0], [], []>} : vector<8x4xf32>, vector<8x4xf32>, vector<8x8xf32> -> vector<8x8xf32>
    %cst_99 = arith.constant dense<0xFF800000> : vector<8xf32>
    %283 = vector.multi_reduction <maximumf>, %282, %cst_99 [1] : vector<8x8xf32> to vector<8xf32>
    %284 = vector.shape_cast %283 : vector<8xf32> to vector<8x1xf32>
    %285 = vector.broadcast %284 : vector<8x1xf32> to vector<8x8xf32>
    %286 = arith.subf %282, %285 : vector<8x8xf32>
    %287 = math.exp %286 : vector<8x8xf32>
    %cst_100 = arith.constant dense<0.000000e+00> : vector<8xf32>
    %288 = vector.multi_reduction <add>, %287, %cst_100 [1] : vector<8x8xf32> to vector<8xf32>
    %289 = vector.shape_cast %288 : vector<8xf32> to vector<8x1xf32>
    %290 = tpu.reciprocal %289 {approx = true} : vector<8x1xf32> -> vector<8x1xf32>
    %291 = vector.broadcast %290 : vector<8x1xf32> to vector<8x8xf32>
    %292 = arith.mulf %287, %291 : vector<8x8xf32>
    %cst_101 = arith.constant dense<0.000000e+00> : vector<8x4xf32>
    %293 = tpu.matmul %292, %281, %cst_101 {dimension_numbers = #tpu.dot_dimension_numbers<[1], [0], [0], [1], [0, 0, 1, 1], [], []>} : vector<8x8xf32>, vector<8x4xf32>, vector<8x4xf32> -> vector<8x4xf32>
    %294 = vector.extract_strided_slice %6 {offsets = [24, 0], sizes = [4, 128], strides = [1, 1]} : vector<128x128xf32> to vector<4x128xf32>
    %cst_102 = arith.constant dense<0.000000e+00> : vector<8x128xf32>
    %295 = tpu.matmul %293, %294, %cst_102 {dimension_numbers = #tpu.dot_dimension_numbers<[1], [0], [0], [1], [0, 0, 1, 1], [], []>} : vector<8x4xf32>, vector<4x128xf32>, vector<8x128xf32> -> vector<8x128xf32>
    %296 = arith.addf %278, %295 : vector<8x128xf32>
    %297 = vector.extract_strided_slice %15 {offsets = [8, 28], sizes = [8, 4], strides = [1, 1]} : vector<16x128xf32> to vector<8x4xf32>
    %298 = vector.extract_strided_slice %18 {offsets = [8, 28], sizes = [8, 4], strides = [1, 1]} : vector<16x128xf32> to vector<8x4xf32>
    %299 = vector.extract_strided_slice %21 {offsets = [8, 28], sizes = [8, 4], strides = [1, 1]} : vector<16x128xf32> to vector<8x4xf32>
    %cst_103 = arith.constant dense<0.000000e+00> : vector<8x8xf32>
    %300 = tpu.matmul %297, %298, %cst_103 {dimension_numbers = #tpu.dot_dimension_numbers<[1], [1], [0], [0], [0, 0, 1, 0], [], []>} : vector<8x4xf32>, vector<8x4xf32>, vector<8x8xf32> -> vector<8x8xf32>
    %cst_104 = arith.constant dense<0xFF800000> : vector<8xf32>
    %301 = vector.multi_reduction <maximumf>, %300, %cst_104 [1] : vector<8x8xf32> to vector<8xf32>
    %302 = vector.shape_cast %301 : vector<8xf32> to vector<8x1xf32>
    %303 = vector.broadcast %302 : vector<8x1xf32> to vector<8x8xf32>
    %304 = arith.subf %300, %303 : vector<8x8xf32>
    %305 = math.exp %304 : vector<8x8xf32>
    %cst_105 = arith.constant dense<0.000000e+00> : vector<8xf32>
    %306 = vector.multi_reduction <add>, %305, %cst_105 [1] : vector<8x8xf32> to vector<8xf32>
    %307 = vector.shape_cast %306 : vector<8xf32> to vector<8x1xf32>
    %308 = tpu.reciprocal %307 {approx = true} : vector<8x1xf32> -> vector<8x1xf32>
    %309 = vector.broadcast %308 : vector<8x1xf32> to vector<8x8xf32>
    %310 = arith.mulf %305, %309 : vector<8x8xf32>
    %cst_106 = arith.constant dense<0.000000e+00> : vector<8x4xf32>
    %311 = tpu.matmul %310, %299, %cst_106 {dimension_numbers = #tpu.dot_dimension_numbers<[1], [0], [0], [1], [0, 0, 1, 1], [], []>} : vector<8x8xf32>, vector<8x4xf32>, vector<8x4xf32> -> vector<8x4xf32>
    %312 = vector.extract_strided_slice %6 {offsets = [28, 0], sizes = [4, 128], strides = [1, 1]} : vector<128x128xf32> to vector<4x128xf32>
    %cst_107 = arith.constant dense<0.000000e+00> : vector<8x128xf32>
    %313 = tpu.matmul %311, %312, %cst_107 {dimension_numbers = #tpu.dot_dimension_numbers<[1], [0], [0], [1], [0, 0, 1, 1], [], []>} : vector<8x4xf32>, vector<4x128xf32>, vector<8x128xf32> -> vector<8x128xf32>
    %314 = arith.addf %296, %313 : vector<8x128xf32>
    %315 = vector.broadcast %10 : vector<1x128xf32> to vector<8x128xf32>
    %316 = arith.addf %314, %315 : vector<8x128xf32>
    %c8 = arith.constant 8 : index
    %c0_108 = arith.constant 0 : index
    %317 = vector.load %arg12[%c8, %c0_108] : memref<16x128xf32, #tpu.memory_space<vmem>>, vector<8x128xf32>
    tpu.vector_store %arg12[%c8, %c0_108], %316 {strides = array<i32>} : memref<16x128xf32, #tpu.memory_space<vmem>>, vector<8x128xf32>,
    return
  }
  func.func @transform_0(%arg0: i32) -> (i32, i32) {
    %c0_i32 = arith.constant 0 : i32
    %c0_i32_0 = arith.constant 0 : i32
    return %arg0, %c0_i32 : i32, i32
  }
  func.func @transform_1(%arg0: i32) -> (i32, i32) {
    %c0_i32 = arith.constant 0 : i32
    %c0_i32_0 = arith.constant 0 : i32
    return %arg0, %c0_i32 : i32, i32
  }
  func.func @transform_2(%arg0: i32) -> (i32, i32) {
    %c0_i32 = arith.constant 0 : i32
    %c0_i32_0 = arith.constant 0 : i32
    return %arg0, %c0_i32 : i32, i32
  }
  func.func @transform_3(%arg0: i32) -> (i32, i32) {
    %c0_i32 = arith.constant 0 : i32
    %c0_i32_0 = arith.constant 0 : i32
    %c0_i32_1 = arith.constant 0 : i32
    return %c0_i32, %c0_i32_0 : i32, i32
  }
  func.func @transform_4(%arg0: i32) -> (i32, i32) {
    %c0_i32 = arith.constant 0 : i32
    %c0_i32_0 = arith.constant 0 : i32
    %c0_i32_1 = arith.constant 0 : i32
    return %c0_i32, %c0_i32_0 : i32, i32
  }
  func.func @transform_5(%arg0: i32) -> (i32, i32) {
    %c0_i32 = arith.constant 0 : i32
    %c0_i32_0 = arith.constant 0 : i32
    %c0_i32_1 = arith.constant 0 : i32
    return %c0_i32, %c0_i32_0 : i32, i32
  }
  func.func @transform_6(%arg0: i32) -> (i32, i32) {
    %c0_i32 = arith.constant 0 : i32
    %c0_i32_0 = arith.constant 0 : i32
    %c0_i32_1 = arith.constant 0 : i32
    return %c0_i32, %c0_i32_0 : i32, i32
  }
  func.func @transform_7(%arg0: i32) -> (i32, i32) {
    %c0_i32 = arith.constant 0 : i32
    %c0_i32_0 = arith.constant 0 : i32
    %c0_i32_1 = arith.constant 0 : i32
    return %c0_i32, %c0_i32_0 : i32, i32
  }
  func.func @transform_8(%arg0: i32) -> (i32, i32) {
    %c0_i32 = arith.constant 0 : i32
    %c0_i32_0 = arith.constant 0 : i32
    %c0_i32_1 = arith.constant 0 : i32
    return %c0_i32, %c0_i32_0 : i32, i32
  }
  func.func @transform_9(%arg0: i32) -> (i32, i32) {
    %c0_i32 = arith.constant 0 : i32
    %c0_i32_0 = arith.constant 0 : i32
    %c0_i32_1 = arith.constant 0 : i32
    return %c0_i32, %c0_i32_0 : i32, i32
  }
  func.func @transform_10(%arg0: i32) -> (i32, i32) {
    %c0_i32 = arith.constant 0 : i32
    %c0_i32_0 = arith.constant 0 : i32
    %c0_i32_1 = arith.constant 0 : i32
    return %c0_i32, %c0_i32_0 : i32, i32
  }
  func.func @transform_11(%arg0: i32) -> (i32, i32) {
    %c0_i32 = arith.constant 0 : i32
    %c0_i32_0 = arith.constant 0 : i32
    return %arg0, %c0_i32 : i32, i32
  }
}

</mosaic_0001>

<bundles_post_ra>
// kernel: tpu_custom_call.1
= control target key start
LH: loop header
LB: loop body
LE: loop exit
PB: predicated region body
PF: predicated region fallthrough
CT: control target
= control target key end

     0   :  { %16 = vsyncpa [#allocation3], 0  ;;  %s2552_s0 = inlined_call_operand.hbm [shape: f32[16,128], index: 0, kind: input, shape index: {}]   ;;  %s2553_s1 = inlined_call_operand.hbm [shape: f32[16,128], index: 1, kind: input, shape index: {}]   ;;  %s2554_s2 = inlined_call_operand.hbm [shape: f32[16,128], index: 2, kind: input, shape index: {}]   ;;  %s2555_s3 = inlined_call_operand.hbm [shape: f32[128,128], index: 3, kind: input, shape index: {}]   ;;  %s2556_s4 = inlined_call_operand.vmem [shape: f32[1,128], index: 4, kind: input, shape index: {}]   ;;  %s2557_s5 = inlined_call_operand.hbm [shape: f32[128,128], index: 5, kind: input, shape index: {}]   ;;  %s2558_s6 = inlined_call_operand.vmem [shape: f32[1,128], index: 6, kind: input, shape index: {}]   ;;  %s2559_s7 = inlined_call_operand.hbm [shape: f32[128,128], index: 7, kind: input, shape index: {}]   ;;  %s2560_s8 = inlined_call_operand.vmem [shape: f32[1,128], index: 8, kind: input, shape index: {}]   ;;  %s2561_s9 = inlined_call_operand.hbm [shape: f32[128,128], index: 9, kind: input, shape index: {}]   ;;  %s2562_s10 = inlined_call_operand.vmem [shape: f32[1,128], index: 10, kind: input, shape index: {}]   ;;  %s2563_s11 = inlined_call_operand.hbm [shape: f32[16,128], index: 11, kind: output, shape index: {}]  }
   0x1   :  { %17 = vsyncpa [#allocation6], 0 }
   0x2   :  { %18 = vsyncpa [#allocation9], 0 }
   0x3   :  { %19 = vsyncpa [#allocation12], 0 }
   0x4   :  { %20 = vsyncpa [#allocation4], 0  ;;  %s38_s19 = sshll.u32 %s2553_s1, 4  ;;  %s2125_s20 = smov [#allocation5]   ;;  %s39_s19 = int_to_ptr.hbm [resolvable:$true] %s38_s19 }
   0x5   :  { %s40_s21 = sshll.u32 %s2125_s20, 4  ;;  %s64_s24 = sshll.u32 %s2555_s3, 4  ;;  %s41_s21 = int_to_ptr.vmem [resolvable:$true] %s40_s21  ;;  %s65_s24 = int_to_ptr.hbm [resolvable:$true] %s64_s24 }
   0x6   :  { %s2126_s25 = smov 128   ;;  %s2127_s26 = smov 8  }
   0x7   :  { %46 = dma.hbm_to_vmem [thread:$0]  %s39_s19, 256, %s41_s21, [#allocation6], %s2126_s25, %s2126_s25, %s2127_s26  }
   0x8   :  { %s2128_s27 = smov [#allocation8]   ;;  %s94_s1 = sshll.u32 %s2559_s7, 4  ;;  %s95_s1 = int_to_ptr.hbm [resolvable:$true] %s94_s1 }
   0x9   :  { %s66_s28 = sshll.u32 %s2128_s27, 4  ;;  %s25_s13 = sshll.u32 %s2552_s0, 4  ;;  %s67_s28 = int_to_ptr.vmem [resolvable:$true] %s66_s28  ;;  %s26_s13 = int_to_ptr.hbm [resolvable:$true] %s25_s13 }
   0xa   :  { %72 = dma.hbm_to_vmem [thread:$0]  %s65_s24, 2048, %s67_s28, [#allocation9], %s2126_s25, %s2126_s25, %s2127_s26  }
   0xb   :  { %s2129_s14 = smov [#allocation11]   ;;  %s2130_s16 = smov [#allocation2]  }
   0xc   :  { %s96_s15 = sshll.u32 %s2129_s14, 4  ;;  %s27_s7 = sshll.u32 %s2130_s16, 4  ;;  %s97_s15 = int_to_ptr.vmem [resolvable:$true] %s96_s15  ;;  %s28_s7 = int_to_ptr.vmem [resolvable:$true] %s27_s7 }
   0xd   :  { %102 = dma.hbm_to_vmem [thread:$0]  %s95_s1, 2048, %s97_s15, [#allocation12], %s2126_s25, %s2126_s25, %s2127_s26  }
   0xe   :  { %s51_s19 = sshll.u32 %s2554_s2, 4  ;;  %s79_s21 = sshll.u32 %s2557_s5, 4  ;;  %s52_s19 = int_to_ptr.hbm [resolvable:$true] %s51_s19  ;;  %s80_s21 = int_to_ptr.hbm [resolvable:$true] %s79_s21 }
   0xf   :  { %33 = dma.hbm_to_vmem [thread:$0]  %s26_s13, 256, %s28_s7, [#allocation3], %s2126_s25, %s2126_s25, %s2127_s26  }
  0x10   :  { %s2131_s22 = smov [#allocation7]   ;;  %s2132_s24 = smov [#allocation10]  }
  0x11   :  { %s53_s23 = sshll.u32 %s2131_s22, 4  ;;  %s81_s2 = sshll.u32 %s2132_s24, 4  ;;  %s54_s23 = int_to_ptr.vmem [resolvable:$true] %s53_s23  ;;  %s82_s2 = int_to_ptr.vmem [resolvable:$true] %s81_s2 }
  0x12   :  { %59 = dma.hbm_to_vmem [thread:$0]  %s52_s19, 256, %s54_s23, [#allocation6], %s2126_s25, %s2126_s25, %s2127_s26  }
  0x13   :  { %s109_s29 = sshll.u32 %s2561_s9, 4  ;;  %s2133_s5 = smov [#allocation13]   ;;  %s110_s29 = int_to_ptr.hbm [resolvable:$true] %s109_s29 }
  0x14   :  { %87 = dma.hbm_to_vmem [thread:$0]  %s80_s21, 2048, %s82_s2, [#allocation9], %s2126_s25, %s2126_s25, %s2127_s26  }
  0x15   :  { %s111_s30 = sshll.u32 %s2133_s5, 4  ;;  %s112_s30 = int_to_ptr.vmem [resolvable:$true] %s111_s30 }
  0x16   :  { %117 = dma.hbm_to_vmem [thread:$0]  %s110_s29, 2048, %s112_s30, [#allocation12], %s2126_s25, %s2126_s25, %s2127_s26  }
  0x17   :  { %2115 = dma.done.wait [#allocation3], 256  }
  0x18   :  { %2116 = vsyncadd [#allocation3], 4294967040 }
  0x19   :  { %2117 = dma.done.wait [#allocation6], 512  }
  0x1a   :  { %2118 = vsyncadd [#allocation6], 4294966784 }
  0x1b   :  { %2119 = dma.done.wait [#allocation9], 4096  }
  0x1c   :  { %2120 = vsyncadd [#allocation9], 4294963200 }
  0x1d   :  { %2121 = dma.done.wait [#allocation12], 4096  }
  0x1e   :  { %2122 = vsyncadd [#allocation12], 4294963200  ;;  %v185_v0 = vld [vmem:[#allocation10 + $0x78] sm:$0xff]  ;;  %v184_v2 = vld [vmem:[#allocation10 + $0x70] sm:$0xff]  ;;  %vm290_vm0 = vcmask 31744   ;;  %s2134_s13 = smov 124  }
  0x1f   :  { %v169_v1 = vld [vmem:[#allocation8 + $0x78] sm:$0xff]  ;;  %241 = vmatpush.msra.mxu1 %v185_v0  ;;  %v168_v3 = vld [vmem:[#allocation8 + $0x70] sm:$0xff]  ;;  %v183_v4 = vld [vmem:[#allocation10 + $0x68] sm:$0xff]  ;;  %vm317_vm1 = vcmask 64512   ;;  %s2137_s15 = smov 116   ;;  %vm423_vm2 = vcmask 1043456  }
  0x20   :  { %213 = vmatpush.msra.mxu0 %v169_v1  ;;  %v167_v5 = vld [vmem:[#allocation8 + $0x68] sm:$0xff]  ;;  %v182_v6 = vld [vmem:[#allocation10 + $0x60] sm:$0xff]  ;;  %v181_v8 = vld [vmem:[#allocation10 + $0x58] sm:$0xff]  ;;  %s2138_s16 = smov 108   ;;  %s2139_s7 = smov 104  }
  0x21   :  { %242 = vmatpush.msra.mxu1 %v184_v2  ;;  %v166_v7 = vld [vmem:[#allocation8 + $0x60] sm:$0xff]  ;;  %v165_v9 = vld [vmem:[#allocation8 + $0x58] sm:$0xff]  ;;  %v180_v10 = vld [vmem:[#allocation10 + $0x50] sm:$0xff]  ;;  %s2140_s17 = smov 100   ;;  %s1742_s22 = sshll.u32 %s2563_s11, 4  ;;  %s1743_s22 = int_to_ptr.hbm [resolvable:$true] %s1742_s22 }
  0x22   :  { %214 = vmatpush.msra.mxu0 %v168_v3  ;;  %v164_v11 = vld [vmem:[#allocation8 + $0x50] sm:$0xff]  ;;  %v179_v12 = vld [vmem:[#allocation10 + $0x48] sm:$0xff]  ;;  %v201_v14 = vld [vmem:[#allocation11 + $0x78] sm:$0xff] }
  0x23   :  { %243 = vmatpush.msra.mxu1 %v183_v4  ;;  %v163_v13 = vld [vmem:[#allocation8 + $0x48] sm:$0xff]  ;;  %v200_v15 = vld [vmem:[#allocation11 + $0x70] sm:$0xff]  ;;  %v178_v16 = vld [vmem:[#allocation10 + $0x40] sm:$0xff]  ;;  %267 = vmatpush.msra.mxu2 %v201_v14 }
  0x24   :  { %215 = vmatpush.msra.mxu0 %v167_v5  ;;  %v162_v17 = vld [vmem:[#allocation8 + $0x40] sm:$0xff]  ;;  %v199_v18 = vld [vmem:[#allocation11 + $0x68] sm:$0xff]  ;;  %v177_v19 = vld [vmem:[#allocation10 + $0x38] sm:$0xff] }
  0x25   :  { %244 = vmatpush.msra.mxu1 %v182_v6  ;;  %v161_v20 = vld [vmem:[#allocation8 + $0x38] sm:$0xff]  ;;  %268 = vmatpush.msra.mxu2 %v200_v15  ;;  %v198_v21 = vld [vmem:[#allocation11 + $0x60] sm:$0xff]  ;;  %v176_v22 = vld [vmem:[#allocation10 + $0x30] sm:$0xff] }
  0x26   :  { %216 = vmatpush.msra.mxu0 %v166_v7  ;;  %v160_v23 = vld [vmem:[#allocation8 + $0x30] sm:$0xff]  ;;  %v175_v24 = vld [vmem:[#allocation10 + $0x28] sm:$0xff]  ;;  %v197_v25 = vld [vmem:[#allocation11 + $0x58] sm:$0xff] }
  0x27   :  { %245 = vmatpush.msra.mxu1 %v181_v8  ;;  %269 = vmatpush.msra.mxu2 %v199_v18  ;;  %v159_v26 = vld [vmem:[#allocation8 + $0x28] sm:$0xff]  ;;  %v196_v27 = vld [vmem:[#allocation11 + $0x50] sm:$0xff]  ;;  %v174_v28 = vld [vmem:[#allocation10 + $0x20] sm:$0xff] }
  0x28   :  { %217 = vmatpush.msra.mxu0 %v165_v9  ;;  %v158_v29 = vld [vmem:[#allocation8 + $0x20] sm:$0xff]  ;;  %v195_v30 = vld [vmem:[#allocation11 + $0x48] sm:$0xff]  ;;  %v173_v31 = vld [vmem:[#allocation10 + $0x18] sm:$0xff] }
  0x29   :  { %246 = vmatpush.msra.mxu1 %v180_v10  ;;  %270 = vmatpush.msra.mxu2 %v198_v21  ;;  %v157_v32 = vld [vmem:[#allocation8 + $0x18] sm:$0xff]  ;;  %v194_v33 = vld [vmem:[#allocation11 + $0x40] sm:$0xff]  ;;  %v172_v34 = vld [vmem:[#allocation10 + $0x10] sm:$0xff] }
  0x2a   :  { %218 = vmatpush.msra.mxu0 %v164_v11  ;;  %v156_v35 = vld [vmem:[#allocation8 + $0x10] sm:$0xff]  ;;  %v193_v36 = vld [vmem:[#allocation11 + $0x38] sm:$0xff]  ;;  %v171_v37 = vld [vmem:[#allocation10 + $0x8] sm:$0xff] }
  0x2b   :  { %247 = vmatpush.msra.mxu1 %v179_v12  ;;  %271 = vmatpush.msra.mxu2 %v197_v25  ;;  %v155_v38 = vld [vmem:[#allocation8 + $0x8] sm:$0xff]  ;;  %v192_v39 = vld [vmem:[#allocation11 + $0x30] sm:$0xff]  ;;  %v170_v40 = vld [vmem:[#allocation10] sm:$0xff] }
  0x2c   :  { %219 = vmatpush.msra.mxu0 %v163_v13  ;;  %v154_v41 = vld [vmem:[#allocation8] sm:$0xff]  ;;  %v148_v43 = vld [vmem:[#allocation2] sm:$0xff]  ;;  %v191_v44 = vld [vmem:[#allocation11 + $0x28] sm:$0xff] }
  0x2d   :  { %248 = vmatpush.msra.mxu1 %v178_v16  ;;  %272 = vmatpush.msra.mxu2 %v196_v27  ;;  %v150_v42 = vld [vmem:[#allocation5] sm:$0xff]  ;;  %v189_v46 = vld [vmem:[#allocation11 + $0x18] sm:$0xff]  ;;  %v188_v47 = vld [vmem:[#allocation11 + $0x10] sm:$0xff] }
  0x2e   :  { %220 = vmatpush.msra.mxu0 %v162_v17  ;;  %v190_v45 = vld [vmem:[#allocation11 + $0x20] sm:$0xff]  ;;  %v187_v48 = vld [vmem:[#allocation11 + $0x8] sm:$0xff]  ;;  %v152_v50 = vld [vmem:[#allocation7] sm:$0xff] }
  0x2f   :  { %249 = vmatpush.msra.mxu1 %v177_v19  ;;  %273 = vmatpush.msra.mxu2 %v195_v30  ;;  %v186_v49 = vld [vmem:[#allocation11] sm:$0xff]  ;;  %v2247_v51 = vld [vmem:[%s2558_s6] ss:$0 sm:$0xff]  ;;  %s2135_s6 = smov 120   ;;  %v149_v61 = vld [vmem:[#allocation2 + $0x8] sm:$0xff] }
  0x30   :  { %221 = vmatpush.msra.mxu0 %v161_v20  ;;  %v2252_v52 = vld [vmem:[%s2556_s4] ss:$0 sm:$0xff]  ;;  %v151_v21 = vld [vmem:[#allocation5 + $0x8] sm:$0xff] }
  0x31   :  { %250 = vmatpush.msra.mxu1 %v176_v22  ;;  %274 = vmatpush.msra.mxu2 %v194_v33  ;;  %v2275_v58 = vld [vmem:[%s2560_s8] ss:$0 sm:$0xff]  ;;  %s2136_s8 = smov 112  }
  0x32   :  { %222 = vmatpush.msra.mxu0 %v160_v23 }
  0x33   :  { %251 = vmatpush.msra.mxu1 %v175_v24  ;;  %275 = vmatpush.msra.mxu2 %v193_v36 }
  0x34   :  { %223 = vmatpush.msra.mxu0 %v159_v26 }
  0x35   :  { %252 = vmatpush.msra.mxu1 %v174_v28  ;;  %276 = vmatpush.msra.mxu2 %v192_v39  ;;  %v153_v28 = vld [vmem:[#allocation7 + $0x8] sm:$0xff] }
  0x36   :  { %224 = vmatpush.msra.mxu0 %v158_v29  ;;  %v2304_v29 = vld [vmem:[#allocation13 + $0x8] sm:$0xff] }
  0x37   :  { %253 = vmatpush.msra.mxu1 %v173_v31  ;;  %277 = vmatpush.msra.mxu2 %v191_v44  ;;  %v628_v30 = vrot.slane %v2304_v29, 4  ;;  %v2322_v44 = vld [vmem:[#allocation13] sm:$0xff] }
  0x38   :  { %225 = vmatpush.msra.mxu0 %v157_v32 }
  0x39   :  { %254 = vmatpush.msra.mxu1 %v172_v34  ;;  %278 = vmatpush.msra.mxu2 %v190_v45  ;;  %v419_v45 = vrot.slane %v2322_v44, 4 }
  0x3a   :  { %226 = vmatpush.msra.mxu0 %v156_v35 }
  0x3b   :  { %255 = vmatpush.msra.mxu1 %v171_v37  ;;  %279 = vmatpush.msra.mxu2 %v189_v46 }
  0x3c   :  { %227 = vmatpush.msra.mxu0 %v155_v38 }
  0x3d   :  { %256 = vmatpush.msra.mxu1 %v170_v40  ;;  %280 = vmatpush.msra.mxu2 %v188_v47 }
  0x3e   :  { %228 = vmatpush.msra.mxu0 %v154_v41  ;;  %257 = vmatmul.f32.vlgmr.msra.gmra.mxu1 %v150_v42 }
  0x3f   :  { %229 = vmatmul.f32.vlgmr.msra.gmra.mxu0 %v148_v43  ;;  %281 = vmatpush.msra.mxu2 %v187_v48 }
  0x41   :  { %282 = vmatpush.msra.mxu2 %v186_v49 }
  0x42   :  { %283 = vmatmul.f32.vlgmr.msra.gmra.mxu2 %v152_v50 }
  0x43   :  { %1771 = vmatpush.msk.msrb.mxu2 %vm423_vm2, %v2304_v29 }
  0x46   :  { %260 = vmatmul.f32.gmra.mxu1 %v151_v21 }
  0x47   :  { %232 = vmatmul.f32.gmra.mxu0 %v149_v61 }
  0x4a   :  { %286 = vmatmul.f32.gmra.mxu2 %v153_v28 }
  0xbb   :  { %v258_v53 = vpop.f32.mrf.mxu1 }
  0xbc   :  { %v230_v54 = vpop.f32.mrf.mxu0  ;;  %v2255_v55 = vadd.f32 %v2247_v51, %v258_v53 }
  0xbd   :  { %v231_v56 = vadd.f32 %v2252_v52, %v230_v54 }
  0xbe   :  { %354 = vrot.lane.b32.xlu2 %v2255_v55, %s2134_s13  ;;  %473 = vrot.lane.b32.xlu0 %v2255_v55, %s2135_s6 }
  0xbf   :  { %v2258_v57 = vmul.f32 0.5, %v231_v56  ;;  %1758 = vmatpush.xpose.msk.msra.mxu3 %vm290_vm0, %v2255_v55 }
  0xc2   :  { %1759 = vmatmul.msk.f32.vlgmr.msra.gmra.mxu3 %vm290_vm0, %v2258_v57 }
  0xc3   :  { %v2312_v31 = vpop.f32.mrf.mxu1 }
  0xc4   :  { %v2287_v3 = vpop.f32.mrf.mxu0 }
  0xc5   :  { %v284_v59 = vpop.f32.mrf.mxu2 }
  0xc6   :  { %352 = vrot.lane.b32.xlu2 %v2258_v57, %s2134_s13  ;;  %471 = vrot.lane.b32.xlu0 %v2258_v57, %s2135_s6  ;;  %v2278_v60 = vadd.f32 %v2275_v58, %v284_v59 }
  0xc8   :  { %347 = vmatpush.msrb.mxu3 %v2278_v60 }
  0xcd   :  { %v2331_v46 = vpop.f32.mrf.mxu2 }
  0xce   :  { %510 = vrot.lane.b32.xlu2 %v2278_v60, %s2135_s6 }
 0x118   :  { %v355_v62 = vpop.permute.xlu2 %354 }
 0x119   :  { %1761 = vmatpush.xpose.msk.msra.mxu3 %vm290_vm0, %v355_v62 }
 0x120   :  { %v353_v11 = vpop.permute.xlu2 %352 }
 0x128   :  { %v511_v14 = vpop.permute.xlu2 %510 }
 0x129   :  { %531 = vmatpush.msrb.mxu1 %v511_v14 }
 0x12b   :  { %1776 = vmatpush.msk.msra.mxu1 %vm423_vm2, %v628_v30 }
 0x130   :  { %v474_v63 = vpop.permute.xlu0 %473 }
 0x131   :  { %1768 = vmatpush.xpose.msk.msrb.mxu0 %vm290_vm0, %v474_v63 }
 0x138   :  { %v472_v0 = vpop.permute.xlu0 %471 }
 0x139   :  { %1769 = vmatmul.msk.f32.vlgmr.msrb.gmra.mxu0 %vm290_vm0, %v472_v0 }
 0x145   :  { %v314_v1 = vpop.f32.mrf.mxu3 }
 0x146   :  { %v318_v2 = vsel %vm317_vm1, %v314_v1, -inf }
 0x147   :  { %319 = vmax.xlane.f32.xlu1 %v318_v2 }
 0x1b6   :  { %v496_v4 = vpop.f32.mrf.mxu0 }
 0x1b7   :  { %v499_v5 = vsel %vm317_vm1, %v496_v4, -inf }
 0x1b8   :  { %500 = vmax.xlane.f32.xlu0 %v499_v5 }
 0x1ba   :  { %v320_v6 = vpop.xlane.xlu1 %319 }
 0x1bb   :  { %v321_v7 = vsub.f32 %v314_v1, %v320_v6 }
 0x1bd   :  { %v322_v8 = vmul.f32 1.442695, %v321_v7 }
 0x1bf   :  { %1859 = vpow2.f32 %v322_v8 }
 0x1c5   :  { %v1860_v9 = vpop.eup %1859 }
 0x1c6   :  { %v324_v10 = vsel %vm317_vm1, %v1860_v9, 0.0 }
 0x1c7   :  { %325 = vadd.xlane.f32.xlu1 %v324_v10 }
 0x1cc   :  { %655 = vrot.lane.b32.xlu0 %v2258_v57, %s2136_s8 }
 0x22b   :  { %v501_v12 = vpop.xlane.xlu0 %500 }
 0x22c   :  { %v502_v13 = vsub.f32 %v496_v4, %v501_v12 }
 0x22e   :  { %v503_v15 = vmul.f32 1.442695, %v502_v13 }
 0x230   :  { %1861 = vpow2.f32 %v503_v15 }
 0x236   :  { %v1862_v16 = vpop.eup %1861 }
 0x237   :  { %v505_v17 = vsel %vm317_vm1, %v1862_v16, 0.0 }
 0x238   :  { %506 = vadd.xlane.f32.xlu1 %v505_v17  ;;  %v2357_v17 = vld [vmem:[#allocation13 + $0x10] sm:$0xff] }
 0x23a   :  { %v326_v18 = vpop.xlane.xlu1 %325 }
 0x23b   :  { %1863 = vrcp.f32 %v326_v18  ;;  %v812_v18 = vrot.slane %v2357_v17, 4 }
 0x23e   :  { %v656_v40 = vpop.permute.xlu0 %655 }
 0x241   :  { %v1864_v19 = vpop.eup %1863 }
 0x242   :  { %v328_v20 = vmul.f32 %v1864_v19, %v1860_v9 }
 0x244   :  { %1760 = vmatmul.msk.f32.vlgmr.msrb.gmra.mxu3 %vm317_vm1, %v328_v20 }
 0x24c   :  { %1762 = vmatmul.msk.f32.vlgmr.msra.gmra.mxu3 %vm290_vm0, %v353_v11 }
 0x2ab   :  { %v507_v22 = vpop.xlane.xlu1 %506 }
 0x2ac   :  { %1865 = vrcp.f32 %v507_v22 }
 0x2b2   :  { %v1866_v23 = vpop.eup %1865 }
 0x2b3   :  { %v509_v24 = vmul.f32 %v1866_v23, %v1862_v16 }
 0x2b5   :  { %1770 = vmatmul.msk.f32.vlgmr.msrb.gmra.mxu1 %vm317_vm1, %v509_v24 }
 0x2c7   :  { %v349_v25 = vpop.f32.mrf.mxu3 }
 0x2cf   :  { %v377_v26 = vpop.f32.mrf.mxu3 }
 0x2d0   :  { %v380_v27 = vsel %vm317_vm1, %v377_v26, -inf }
 0x2d1   :  { %381 = vmax.xlane.f32.xlu1 %v380_v27 }
 0x2ea   :  { %392 = vrot.lane.b32.xlu1 %v2278_v60, %s2134_s13 }
 0x2f2   :  { %657 = vrot.lane.b32.xlu1 %v2255_v55, %s2136_s8 }
 0x2fa   :  { %565 = vrot.lane.b32.xlu1 %v2255_v55, %s2137_s15 }
 0x332   :  { %v533_v32 = vpop.f32.mrf.mxu1 }
 0x333   :  { %1772 = vmatmul.msk.f32.vlgmr.msrb.gmra.mxu2 %vm290_vm0, %v533_v32 }
 0x344   :  { %v382_v33 = vpop.xlane.xlu1 %381 }
 0x345   :  { %v383_v34 = vsub.f32 %v377_v26, %v382_v33 }
 0x347   :  { %v384_v35 = vmul.f32 1.442695, %v383_v34 }
 0x349   :  { %1867 = vpow2.f32 %v384_v35 }
 0x34f   :  { %v1868_v36 = vpop.eup %1867 }
 0x350   :  { %v386_v37 = vsel %vm317_vm1, %v1868_v36, 0.0 }
 0x351   :  { %387 = vadd.xlane.f32.xlu2 %v386_v37 }
 0x35c   :  { %v393_v38 = vpop.permute.xlu1 %392 }
 0x35d   :  { %413 = vmatpush.msrb.mxu3 %v393_v38 }
 0x35f   :  { %1764 = vmatpush.msk.msra.mxu3 %vm423_vm2, %v419_v45 }
 0x364   :  { %v658_v39 = vpop.permute.xlu1 %657 }
 0x365   :  { %1778 = vmatpush.xpose.msk.msra.mxu2 %vm290_vm0, %v658_v39 }
 0x368   :  { %1779 = vmatmul.msk.f32.vlgmr.msra.gmra.mxu2 %vm290_vm0, %v656_v40 }
 0x369   :  { %563 = vrot.lane.b32.xlu2 %v2258_v57, %s2137_s15 }
 0x36c   :  { %v566_v54 = vpop.permute.xlu1 %565 }
 0x371   :  { %694 = vrot.lane.b32.xlu2 %v2278_v60, %s2136_s8 }
 0x3b6   :  { %v2333_v47 = vpop.f32.mrf.mxu2 }
 0x3c4   :  { %v388_v41 = vpop.xlane.xlu2 %387 }
 0x3c5   :  { %1869 = vrcp.f32 %v388_v41 }
 0x3cb   :  { %v1870_v42 = vpop.eup %1869 }
 0x3cc   :  { %v390_v43 = vmul.f32 %v1870_v42, %v1868_v36  ;;  %v564_v50 = vpop.permute.xlu2 %563 }
 0x3ce   :  { %1763 = vmatmul.msk.f32.vlgmr.msrb.gmra.mxu3 %vm317_vm1, %v390_v43 }
 0x3cf   :  { %1766 = vmatpush.msk.msrb.mxu3 %vm423_vm2, %v2322_v44 }
 0x3d4   :  { %v695_v56 = vpop.permute.xlu2 %694 }
 0x3eb   :  { %v680_v48 = vpop.f32.mrf.mxu2 }
 0x3ec   :  { %v683_v49 = vsel %vm317_vm1, %v680_v48, -inf }
 0x3ed   :  { %684 = vmax.xlane.f32.xlu1 %v683_v49 }
 0x451   :  { %v415_v53 = vpop.f32.mrf.mxu3 }
 0x452   :  { %1765 = vmatmul.msk.f32.vlgmr.msra.gmra.mxu3 %vm290_vm0, %v415_v53 }
 0x453   :  { %1773 = vmatpush.xpose.msk.msra.mxu3 %vm290_vm0, %v566_v54 }
 0x45a   :  { %1767 = vmatmul.msk.f32.vlgmr.msrb.gmra.mxu3 %vm290_vm0, %v349_v25 }
 0x45b   :  { %715 = vmatpush.msrb.mxu3 %v695_v56 }
 0x460   :  { %v685_v59 = vpop.xlane.xlu1 %684 }
 0x461   :  { %v686_v61 = vsub.f32 %v680_v48, %v685_v59 }
 0x462   :  { %1774 = vmatmul.msk.f32.vlgmr.msra.gmra.mxu3 %vm290_vm0, %v564_v50 }
 0x463   :  { %v687_v62 = vmul.f32 1.442695, %v686_v61  ;;  %1786 = vmatpush.msk.msra.mxu3 %vm423_vm2, %v812_v18 }
 0x465   :  { %1871 = vpow2.f32 %v687_v62 }
 0x46b   :  { %v1872_v63 = vpop.eup %1871 }
 0x46c   :  { %v689_v0 = vsel %vm317_vm1, %v1872_v63, 0.0 }
 0x46d   :  { %690 = vadd.xlane.f32.xlu0 %v689_v0 }
 0x481   :  { %602 = vrot.lane.b32.xlu0 %v2278_v60, %s2137_s15 }
 0x489   :  { %749 = vrot.lane.b32.xlu0 %v2255_v55, %s2138_s16 }
 0x491   :  { %747 = vrot.lane.b32.xlu0 %v2258_v57, %s2138_s16 }
 0x4d5   :  { %v443_v1 = vpop.f32.mrf.mxu3 }
 0x4dd   :  { %v468_v2 = vpop.f32.mrf.mxu3 }
 0x4de   :  { %v469_v4 = vadd.f32 %v468_v2, %v443_v1  ;;  %v2395_v2 = vadd.f32 %v2247_v51, %v2312_v31  ;;  %v2415_v31 = vadd.f32 %v2275_v58, %v2331_v46 }
 0x4e0   :  { %v691_v5 = vpop.xlane.xlu0 %690  ;;  %v562_v34 = vadd.f32 %v2333_v47, %v469_v4  ;;  %v234_v4 = vadd.f32 %v2252_v52, %v2287_v3 }
 0x4e1   :  { %1873 = vrcp.f32 %v691_v5 }
 0x4e2   :  { %v2407_v51 = vmul.f32 0.5, %v234_v4 }
 0x4e5   :  { %v588_v6 = vpop.f32.mrf.mxu3 }
 0x4e6   :  { %v591_v7 = vsel %vm317_vm1, %v588_v6, -inf }
 0x4e7   :  { %v1874_v8 = vpop.eup %1873  ;;  %592 = vmax.xlane.f32.xlu2 %v591_v7 }
 0x4e8   :  { %v693_v9 = vmul.f32 %v1874_v8, %v1872_v63 }
 0x4ea   :  { %1780 = vmatmul.msk.f32.vlgmr.msrb.gmra.mxu3 %vm317_vm1, %v693_v9 }
 0x4f3   :  { %v603_v10 = vpop.permute.xlu0 %602 }
 0x4f4   :  { %623 = vmatpush.msra.mxu0 %v603_v10 }
 0x4f6   :  { %1781 = vmatpush.msk.msrb.mxu0 %vm423_vm2, %v2357_v17 }
 0x4fb   :  { %v750_v11 = vpop.permute.xlu0 %749 }
 0x4fc   :  { %1783 = vmatpush.xpose.msk.msrb.mxu1 %vm290_vm0, %v750_v11 }
 0x4ff   :  { %839 = vrot.lane.b32.xlu2 %v2258_v57, %s2139_s7 }
 0x503   :  { %v748_v27 = vpop.permute.xlu0 %747 }
 0x507   :  { %878 = vrot.lane.b32.xlu2 %v2278_v60, %s2139_s7 }
 0x55a   :  { %v593_v12 = vpop.xlane.xlu2 %592 }
 0x55b   :  { %v594_v13 = vsub.f32 %v588_v6, %v593_v12 }
 0x55d   :  { %v595_v14 = vmul.f32 1.442695, %v594_v13 }
 0x55f   :  { %1875 = vpow2.f32 %v595_v14 }
 0x562   :  { %v840_v24 = vpop.permute.xlu2 %839 }
 0x565   :  { %v1876_v15 = vpop.eup %1875 }
 0x566   :  { %v597_v16 = vsel %vm317_vm1, %v1876_v15, 0.0 }
 0x567   :  { %598 = vadd.xlane.f32.xlu1 %v597_v16 }
 0x56a   :  { %v879_v26 = vpop.permute.xlu2 %878 }
 0x56d   :  { %v717_v22 = vpop.f32.mrf.mxu3 }
 0x580   :  { %841 = vrot.lane.b32.xlu1 %v2255_v55, %s2139_s7 }
 0x5da   :  { %v599_v19 = vpop.xlane.xlu1 %598 }
 0x5db   :  { %1877 = vrcp.f32 %v599_v19 }
 0x5e1   :  { %v1878_v20 = vpop.eup %1877 }
 0x5e2   :  { %v601_v21 = vmul.f32 %v1878_v20, %v1876_v15 }
 0x5e4   :  { %1775 = vmatmul.msk.f32.vlgmr.msra.gmra.mxu0 %vm317_vm1, %v601_v21 }
 0x5ec   :  { %1782 = vmatmul.msk.f32.vlgmr.msrb.gmra.mxu0 %vm290_vm0, %v717_v22 }
 0x5f2   :  { %v842_v23 = vpop.permute.xlu1 %841 }
 0x5f3   :  { %1788 = vmatpush.xpose.msk.msra.mxu0 %vm290_vm0, %v842_v23 }
 0x5f6   :  { %1789 = vmatmul.msk.f32.vlgmr.msra.gmra.mxu0 %vm290_vm0, %v840_v24 }
 0x661   :  { %v625_v25 = vpop.f32.mrf.mxu0 }
 0x662   :  { %1777 = vmatmul.msk.f32.vlgmr.msra.gmra.mxu1 %vm290_vm0, %v625_v25 }
 0x663   :  { %899 = vmatpush.msra.mxu1 %v879_v26 }
 0x669   :  { %v2371_v28 = vpop.f32.mrf.mxu0 }
 0x66a   :  { %1784 = vmatmul.msk.f32.vlgmr.msrb.gmra.mxu1 %vm290_vm0, %v748_v27 }
 0x673   :  { %v864_v32 = vpop.f32.mrf.mxu0 }
 0x674   :  { %v867_v33 = vsel %vm317_vm1, %v864_v32, -inf }
 0x675   :  { %868 = vmax.xlane.f32.xlu1 %v867_v33 }
 0x6df   :  { %v651_v35 = vpop.f32.mrf.mxu1 }
 0x6e0   :  { %v654_v36 = vadd.f32 %v651_v35, %v562_v34 }
 0x6e2   :  { %v746_v58 = vadd.f32 %v2371_v28, %v654_v36 }
 0x6e7   :  { %v772_v37 = vpop.f32.mrf.mxu1 }
 0x6e8   :  { %v869_v38 = vpop.xlane.xlu1 %868  ;;  %v775_v39 = vsel %vm317_vm1, %v772_v37, -inf }
 0x6e9   :  { %v870_v40 = vsub.f32 %v864_v32, %v869_v38  ;;  %776 = vmax.xlane.f32.xlu2 %v775_v39 }
 0x6eb   :  { %v871_v41 = vmul.f32 1.442695, %v870_v40 }
 0x6ed   :  { %1879 = vpow2.f32 %v871_v41 }
 0x6f3   :  { %v1880_v42 = vpop.eup %1879 }
 0x6f4   :  { %v873_v43 = vsel %vm317_vm1, %v1880_v42, 0.0 }
 0x6f5   :  { %874 = vadd.xlane.f32.xlu0 %v873_v43 }
 0x701   :  { %931 = vrot.lane.b32.xlu2 %v2258_v57, %s2140_s17  ;;  %v2385_v57 = vld [vmem:[#allocation13 + $0x18] sm:$0xff] }
 0x702   :  { %v996_v62 = vrot.slane %v2385_v57, 4 }
 0x704   :  { %1796 = vmatpush.msk.msrb.mxu1 %vm423_vm2, %v996_v62 }
 0x709   :  { %786 = vrot.lane.b32.xlu0 %v2278_v60, %s2138_s16 }
 0x75c   :  { %v777_v47 = vpop.xlane.xlu2 %776 }
 0x75d   :  { %v778_v48 = vsub.f32 %v772_v37, %v777_v47 }
 0x75f   :  { %v779_v49 = vmul.f32 1.442695, %v778_v48 }
 0x761   :  { %1881 = vpow2.f32 %v779_v49 }
 0x764   :  { %v932_v52 = vpop.permute.xlu2 %931 }
 0x767   :  { %v1882_v50 = vpop.eup %1881 }
 0x768   :  { %v875_v53 = vpop.xlane.xlu0 %874  ;;  %v781_v54 = vsel %vm317_vm1, %v1882_v50, 0.0 }
 0x769   :  { %1883 = vrcp.f32 %v875_v53  ;;  %782 = vadd.xlane.f32.xlu1 %v781_v54  ;;  %v2471_v53 = vld [vmem:[%s2562_s10] ss:$0 sm:$0xff]  ;;  %s2141_s10 = smov [#allocation14]  }
 0x76a   :  { %s1740_s0 = sshll.u32 %s2141_s10, 4  ;;  %s1741_s0 = int_to_ptr.vmem [resolvable:$true] %s1740_s0 }
 0x76f   :  { %v1884_v56 = vpop.eup %1883 }
 0x770   :  { %v877_v59 = vmul.f32 %v1884_v56, %v1880_v42 }
 0x772   :  { %1790 = vmatmul.msk.f32.vlgmr.msra.gmra.mxu1 %vm317_vm1, %v877_v59 }
 0x77b   :  { %v787_v61 = vpop.permute.xlu0 %786 }
 0x77c   :  { %807 = vmatpush.msrb.mxu2 %v787_v61 }
 0x77e   :  { %1791 = vmatpush.msk.msra.mxu2 %vm423_vm2, %v2385_v57 }
 0x782   :  { %933 = vrot.lane.b32.xlu1 %v2255_v55, %s2140_s17 }
 0x7dc   :  { %v783_v63 = vpop.xlane.xlu1 %782 }
 0x7dd   :  { %1885 = vrcp.f32 %v783_v63 }
 0x7e3   :  { %v1886_v0 = vpop.eup %1885 }
 0x7e4   :  { %v785_v1 = vmul.f32 %v1886_v0, %v1882_v50 }
 0x7e6   :  { %1785 = vmatmul.msk.f32.vlgmr.msrb.gmra.mxu2 %vm317_vm1, %v785_v1 }
 0x7e7   :  { %1798 = vmatpush.xpose.msk.msrb.mxu2 %vm290_vm0, %v2395_v2 }
 0x7ef   :  { %v901_v55 = vpop.f32.mrf.mxu1 }
 0x7f0   :  { %1792 = vmatmul.msk.f32.vlgmr.msra.gmra.mxu2 %vm290_vm0, %v901_v55 }
 0x7f1   :  { %1804 = vmatpush.msk.msra.mxu2 %vm423_vm2, %v419_v45 }
 0x7f4   :  { %v934_v5 = vpop.permute.xlu1 %933 }
 0x7f5   :  { %1793 = vmatpush.xpose.msk.msrb.mxu3 %vm290_vm0, %v934_v5 }
 0x7f8   :  { %1799 = vmatmul.msk.f32.vlgmr.msrb.gmra.mxu2 %vm290_vm0, %v2407_v51 }
 0x7f9   :  { %1811 = vmatpush.msk.msrb.mxu2 %vm423_vm2, %v2304_v29 }
 0x869   :  { %v809_v6 = vpop.f32.mrf.mxu2 }
 0x86a   :  { %1787 = vmatmul.msk.f32.vlgmr.msra.gmra.mxu3 %vm290_vm0, %v809_v6 }
 0x86b   :  { %1083 = vmatpush.msra.mxu3 %v2415_v31 }
 0x872   :  { %1794 = vmatmul.msk.f32.vlgmr.msrb.gmra.mxu3 %vm290_vm0, %v932_v52 }
 0x873   :  { %v2420_v3 = vpop.f32.mrf.mxu2  ;;  %1806 = vmatpush.msk.msrb.mxu3 %vm423_vm2, %v2322_v44 }
 0x87b   :  { %v1051_v45 = vpop.f32.mrf.mxu2 }
 0x87c   :  { %v1054_v7 = vsel %vm317_vm1, %v1051_v45, -inf }
 0x87d   :  { %1055 = vmax.xlane.f32.xlu0 %v1054_v7 }
 0x891   :  { %1090 = vrot.lane.b32.xlu0 %v2395_v2, %s2134_s13 }
 0x899   :  { %1202 = vrot.lane.b32.xlu0 %v2395_v2, %s2135_s6 }
 0x8ed   :  { %v835_v46 = vpop.f32.mrf.mxu3 }
 0x8ee   :  { %v2430_v8 = vadd.f32 %v835_v46, %v746_v58 }
 0x8f0   :  { %v1056_v9 = vpop.xlane.xlu0 %1055  ;;  %v930_v50 = vadd.f32 %v2420_v3, %v2430_v8 }
 0x8f1   :  { %v1057_v10 = vsub.f32 %v1051_v45, %v1056_v9 }
 0x8f3   :  { %v1058_v11 = vmul.f32 1.442695, %v1057_v10 }
 0x8f5   :  { %1887 = vpow2.f32 %v1058_v11  ;;  %v956_v44 = vpop.f32.mrf.mxu3 }
 0x8f6   :  { %v959_v12 = vsel %vm317_vm1, %v956_v44, -inf }
 0x8f7   :  { %960 = vmax.xlane.f32.xlu2 %v959_v12 }
 0x8fb   :  { %v1888_v13 = vpop.eup %1887 }
 0x8fc   :  { %v1060_v14 = vsel %vm317_vm1, %v1888_v13, 0.0 }
 0x8fd   :  { %1061 = vadd.xlane.f32.xlu1 %v1060_v14 }
 0x903   :  { %v1091_v25 = vpop.permute.xlu0 %1090 }
 0x90b   :  { %v1203_v27 = vpop.permute.xlu0 %1202 }
 0x90f   :  { %1088 = vrot.lane.b32.xlu2 %v2407_v51, %s2134_s13 }
 0x916   :  { %970 = vrot.lane.b32.xlu1 %v2278_v60, %s2140_s17 }
 0x91e   :  { %1291 = vrot.lane.b32.xlu1 %v2395_v2, %s2137_s15 }
 0x926   :  { %1289 = vrot.lane.b32.xlu1 %v2407_v51, %s2137_s15 }
 0x96a   :  { %v961_v15 = vpop.xlane.xlu2 %960 }
 0x96b   :  { %v962_v16 = vsub.f32 %v956_v44, %v961_v15 }
 0x96d   :  { %v963_v19 = vmul.f32 1.442695, %v962_v16 }
 0x96f   :  { %1889 = vpow2.f32 %v963_v19 }
 0x970   :  { %v1062_v20 = vpop.xlane.xlu1 %1061 }
 0x971   :  { %1891 = vrcp.f32 %v1062_v20 }
 0x972   :  { %v1089_v34 = vpop.permute.xlu2 %1088 }
 0x975   :  { %v1890_v21 = vpop.eup %1889 }
 0x976   :  { %v965_v22 = vsel %vm317_vm1, %v1890_v21, 0.0 }
 0x977   :  { %v1892_v23 = vpop.eup %1891  ;;  %966 = vadd.xlane.f32.xlu0 %v965_v22 }
 0x978   :  { %v1064_v24 = vmul.f32 %v1892_v23, %v1888_v13 }
 0x97a   :  { %1800 = vmatmul.msk.f32.vlgmr.msra.gmra.mxu3 %vm317_vm1, %v1064_v24 }
 0x988   :  { %v971_v60 = vpop.permute.xlu1 %970 }
 0x989   :  { %991 = vmatpush.msrb.mxu0 %v971_v60 }
 0x98b   :  { %1801 = vmatpush.xpose.msk.msra.mxu0 %vm290_vm0, %v1091_v25  ;;  %1200 = vrot.lane.b32.xlu0 %v2407_v51, %s2135_s6 }
 0x990   :  { %v1292_v26 = vpop.permute.xlu1 %1291 }
 0x991   :  { %1813 = vmatpush.xpose.msk.msra.mxu3 %vm290_vm0, %v1292_v26 }
 0x998   :  { %v1290_v37 = vpop.permute.xlu1 %1289 }
 0x9ea   :  { %v967_v28 = vpop.xlane.xlu0 %966 }
 0x9eb   :  { %1893 = vrcp.f32 %v967_v28 }
 0x9f1   :  { %v1894_v32 = vpop.eup %1893 }
 0x9f2   :  { %v969_v33 = vmul.f32 %v1894_v32, %v1890_v21 }
 0x9f4   :  { %1795 = vmatmul.msk.f32.vlgmr.msrb.gmra.mxu0 %vm317_vm1, %v969_v33 }
 0x9f5   :  { %1808 = vmatpush.xpose.msk.msrb.mxu0 %vm290_vm0, %v1203_v27 }
 0x9fc   :  { %1802 = vmatmul.msk.f32.vlgmr.msra.gmra.mxu0 %vm290_vm0, %v1089_v34 }
 0x9fd   :  { %v1085_v35 = vpop.f32.mrf.mxu3  ;;  %v1201_v36 = vpop.permute.xlu0 %1200 }
 0x9fe   :  { %1807 = vmatmul.msk.f32.vlgmr.msrb.gmra.mxu3 %vm290_vm0, %v1085_v35 }
 0xa04   :  { %1809 = vmatmul.msk.f32.vlgmr.msrb.gmra.mxu0 %vm290_vm0, %v1201_v36 }
 0xa06   :  { %1814 = vmatmul.msk.f32.vlgmr.msra.gmra.mxu3 %vm290_vm0, %v1290_v37 }
 0xa71   :  { %v993_v38 = vpop.f32.mrf.mxu0 }
 0xa72   :  { %1797 = vmatmul.msk.f32.vlgmr.msrb.gmra.mxu1 %vm290_vm0, %v993_v38 }
 0xa79   :  { %v1113_v39 = vpop.f32.mrf.mxu0 }
 0xa7a   :  { %v1116_v40 = vsel %vm317_vm1, %v1113_v39, -inf }
 0xa7b   :  { %1117 = vmax.xlane.f32.xlu2 %v1116_v40 }
 0xa81   :  { %v2456_v41 = vpop.f32.mrf.mxu3  ;;  %v1225_v42 = vpop.f32.mrf.mxu0 }
 0xa82   :  { %v1228_v43 = vsel %vm317_vm1, %v1225_v42, -inf }
 0xa83   :  { %1229 = vmax.xlane.f32.xlu0 %v1228_v43 }
 0xa89   :  { %v1314_v47 = vpop.f32.mrf.mxu3 }
 0xa8a   :  { %v1317_v48 = vsel %vm317_vm1, %v1314_v47, -inf }
 0xa8b   :  { %1318 = vmax.xlane.f32.xlu1 %v1317_v48 }
 0xaa4   :  { %1128 = vrot.lane.b32.xlu1 %v2415_v31, %s2134_s13 }
 0xaac   :  { %1380 = vrot.lane.b32.xlu1 %v2395_v2, %s2136_s8 }
 0xab4   :  { %1469 = vrot.lane.b32.xlu1 %v2395_v2, %s2138_s16 }
 0xaee   :  { %v1118_v49 = vpop.xlane.xlu2 %1117 }
 0xaef   :  { %v1119_v54 = vsub.f32 %v1113_v39, %v1118_v49  ;;  %v1019_v56 = vpop.f32.mrf.mxu1 }
 0xaf0   :  { %v1022_v59 = vadd.f32 %v1019_v56, %v930_v50 }
 0xaf1   :  { %v1120_v61 = vmul.f32 1.442695, %v1119_v54 }
 0xaf2   :  { %v1026_v63 = vadd.f32 %v2471_v53, %v1022_v59 }
 0xaf3   :  { %1895 = vpow2.f32 %v1120_v61 }
 0xaf4   :  { %1027 = vst [vmem:[#allocation14] sm:$0xff] %v1026_v63 }
 0xaf6   :  { %v1230_v0 = vpop.xlane.xlu0 %1229 }
 0xaf7   :  { %v1231_v1 = vsub.f32 %v1225_v42, %v1230_v0 }
 0xaf9   :  { %v1896_v55 = vpop.eup %1895  ;;  %v1232_v4 = vmul.f32 1.442695, %v1231_v1 }
 0xafa   :  { %v1122_v5 = vsel %vm317_vm1, %v1896_v55, 0.0 }
 0xafb   :  { %1897 = vpow2.f32 %v1232_v4  ;;  %1123 = vadd.xlane.f32.xlu2 %v1122_v5 }
 0xafe   :  { %v1319_v6 = vpop.xlane.xlu1 %1318 }
 0xaff   :  { %v1320_v52 = vsub.f32 %v1314_v47, %v1319_v6 }
 0xb01   :  { %v1898_v3 = vpop.eup %1897  ;;  %v1321_v45 = vmul.f32 1.442695, %v1320_v52 }
 0xb02   :  { %v1234_v7 = vsel %vm317_vm1, %v1898_v3, 0.0 }
 0xb03   :  { %1899 = vpow2.f32 %v1321_v45  ;;  %1235 = vadd.xlane.f32.xlu0 %v1234_v7 }
 0xb09   :  { %v1900_v58 = vpop.eup %1899 }
 0xb0a   :  { %v1323_v46 = vsel %vm317_vm1, %v1900_v58, 0.0 }
 0xb0b   :  { %1324 = vadd.xlane.f32.xlu2 %v1323_v46 }
 0xb16   :  { %v1129_v8 = vpop.permute.xlu1 %1128 }
 0xb17   :  { %1239 = vrot.lane.b32.xlu0 %v2415_v31, %s2135_s6  ;;  %1149 = vmatpush.msra.mxu1 %v1129_v8 }
 0xb1e   :  { %v1381_v13 = vpop.permute.xlu1 %1380 }
 0xb1f   :  { %1378 = vrot.lane.b32.xlu0 %v2407_v51, %s2136_s8 }
 0xb23   :  { %1328 = vrot.lane.b32.xlu2 %v2415_v31, %s2137_s15 }
 0xb26   :  { %v1470_v22 = vpop.permute.xlu1 %1469 }
 0xb2b   :  { %1467 = vrot.lane.b32.xlu2 %v2407_v51, %s2138_s16 }
 0xb6e   :  { %v1124_v9 = vpop.xlane.xlu2 %1123 }
 0xb6f   :  { %1901 = vrcp.f32 %v1124_v9 }
 0xb75   :  { %v1902_v10 = vpop.eup %1901 }
 0xb76   :  { %v1126_v11 = vmul.f32 %v1902_v10, %v1896_v55  ;;  %v1236_v44 = vpop.xlane.xlu0 %1235 }
 0xb78   :  { %1803 = vmatmul.msk.f32.vlgmr.msra.gmra.mxu1 %vm317_vm1, %v1126_v11 }
 0xb7e   :  { %v1325_v12 = vpop.xlane.xlu2 %1324 }
 0xb7f   :  { %1903 = vrcp.f32 %v1325_v12 }
 0xb80   :  { %1905 = vrcp.f32 %v1236_v44 }
 0xb85   :  { %v1904_v14 = vpop.eup %1903 }
 0xb86   :  { %v1906_v15 = vpop.eup %1905  ;;  %v1327_v16 = vmul.f32 %v1904_v14, %v1900_v58  ;;  %v1329_v19 = vpop.permute.xlu2 %1328 }
 0xb87   :  { %1349 = vmatpush.msra.mxu0 %v1329_v19  ;;  %v1238_v20 = vmul.f32 %v1906_v15, %v1898_v3 }
 0xb88   :  { %1815 = vmatmul.msk.f32.vlgmr.msra.gmra.mxu0 %vm317_vm1, %v1327_v16 }
 0xb89   :  { %v1240_v21 = vpop.permute.xlu0 %1239  ;;  %1821 = vmatpush.msk.msrb.mxu0 %vm423_vm2, %v2357_v17 }
 0xb8a   :  { %1260 = vmatpush.msrb.mxu1 %v1240_v21 }
 0xb8b   :  { %1810 = vmatmul.msk.f32.vlgmr.msrb.gmra.mxu1 %vm317_vm1, %v1238_v20 }
 0xb8c   :  { %1816 = vmatpush.msk.msra.mxu1 %vm423_vm2, %v628_v30 }
 0xb8e   :  { %1823 = vmatpush.xpose.msk.msrb.mxu1 %vm290_vm0, %v1470_v22  ;;  %v1468_v25 = vpop.permute.xlu2 %1467 }
 0xb91   :  { %v1379_v26 = vpop.permute.xlu0 %1378 }
 0xbf5   :  { %v1151_v23 = vpop.f32.mrf.mxu1 }
 0xbf6   :  { %1805 = vmatmul.msk.f32.vlgmr.msra.gmra.mxu2 %vm290_vm0, %v1151_v23 }
 0xbf7   :  { %1818 = vmatpush.xpose.msk.msra.mxu2 %vm290_vm0, %v1381_v13 }
 0xc05   :  { %v1351_v24 = vpop.f32.mrf.mxu0 }
 0xc06   :  { %1817 = vmatmul.msk.f32.vlgmr.msra.gmra.mxu1 %vm290_vm0, %v1351_v24 }
 0xc08   :  { %v1262_v60 = vpop.f32.mrf.mxu1 }
 0xc09   :  { %1812 = vmatmul.msk.f32.vlgmr.msrb.gmra.mxu2 %vm290_vm0, %v1262_v60 }
 0xc0e   :  { %1824 = vmatmul.msk.f32.vlgmr.msrb.gmra.mxu1 %vm290_vm0, %v1468_v25 }
 0xc11   :  { %1819 = vmatmul.msk.f32.vlgmr.msra.gmra.mxu2 %vm290_vm0, %v1379_v26 }
 0xc79   :  { %v1174_v30 = vpop.f32.mrf.mxu2 }
 0xc7a   :  { %v1198_v27 = vadd.f32 %v2456_v41, %v1174_v30 }
 0xc83   :  { %v1374_v29 = vpop.f32.mrf.mxu1 }
 0xc8b   :  { %v1492_v28 = vpop.f32.mrf.mxu1 }
 0xc8c   :  { %v1285_v32 = vpop.f32.mrf.mxu2  ;;  %v1495_v33 = vsel %vm317_vm1, %v1492_v28, -inf }
 0xc8d   :  { %v1288_v34 = vadd.f32 %v1285_v32, %v1198_v27  ;;  %1496 = vmax.xlane.f32.xlu1 %v1495_v33 }
 0xc8f   :  { %v1377_v35 = vadd.f32 %v1374_v29, %v1288_v34 }
 0xc94   :  { %v1403_v36 = vpop.f32.mrf.mxu2 }
 0xc95   :  { %v1406_v37 = vsel %vm317_vm1, %v1403_v36, -inf }
 0xc96   :  { %1407 = vmax.xlane.f32.xlu0 %v1406_v37 }
 0xca6   :  { %1506 = vrot.lane.b32.xlu1 %v2415_v31, %s2138_s16 }
 0xcae   :  { %1645 = vrot.lane.b32.xlu1 %v2407_v51, %s2140_s17 }
 0xd00   :  { %v1497_v38 = vpop.xlane.xlu1 %1496 }
 0xd01   :  { %v1498_v39 = vsub.f32 %v1492_v28, %v1497_v38 }
 0xd03   :  { %v1499_v40 = vmul.f32 1.442695, %v1498_v39 }
 0xd05   :  { %1907 = vpow2.f32 %v1499_v40 }
 0xd09   :  { %v1408_v41 = vpop.xlane.xlu0 %1407 }
 0xd0a   :  { %v1409_v42 = vsub.f32 %v1403_v36, %v1408_v41 }
 0xd0b   :  { %v1908_v43 = vpop.eup %1907 }
 0xd0c   :  { %v1410_v47 = vmul.f32 1.442695, %v1409_v42  ;;  %v1501_v48 = vsel %vm317_vm1, %v1908_v43, 0.0 }
 0xd0d   :  { %1502 = vadd.xlane.f32.xlu0 %v1501_v48 }
 0xd0e   :  { %1909 = vpow2.f32 %v1410_v47 }
 0xd14   :  { %v1910_v49 = vpop.eup %1909 }
 0xd15   :  { %v1412_v50 = vsel %vm317_vm1, %v1910_v49, 0.0 }
 0xd16   :  { %1413 = vadd.xlane.f32.xlu2 %v1412_v50 }
 0xd18   :  { %v1507_v54 = vpop.permute.xlu1 %1506 }
 0xd19   :  { %1527 = vmatpush.msrb.mxu2 %v1507_v54 }
 0xd1b   :  { %1831 = vmatpush.msk.msra.mxu2 %vm423_vm2, %v2385_v57 }
 0xd20   :  { %v1646_v5 = vpop.permute.xlu1 %1645 }
 0xd21   :  { %1558 = vrot.lane.b32.xlu0 %v2395_v2, %s2139_s7 }
 0xd29   :  { %1647 = vrot.lane.b32.xlu0 %v2395_v2, %s2140_s17 }
 0xd2e   :  { %1417 = vrot.lane.b32.xlu2 %v2415_v31, %s2136_s8 }
 0xd36   :  { %1556 = vrot.lane.b32.xlu2 %v2407_v51, %s2139_s7 }
 0xd80   :  { %v1503_v56 = vpop.xlane.xlu0 %1502 }
 0xd81   :  { %1911 = vrcp.f32 %v1503_v56 }
 0xd87   :  { %v1912_v59 = vpop.eup %1911 }
 0xd88   :  { %v1505_v61 = vmul.f32 %v1912_v59, %v1908_v43 }
 0xd89   :  { %v1414_v63 = vpop.xlane.xlu2 %1413 }
 0xd8a   :  { %1913 = vrcp.f32 %v1414_v63  ;;  %1825 = vmatmul.msk.f32.vlgmr.msrb.gmra.mxu2 %vm317_vm1, %v1505_v61 }
 0xd90   :  { %v1914_v0 = vpop.eup %1913 }
 0xd91   :  { %v1416_v1 = vmul.f32 %v1914_v0, %v1910_v49  ;;  %v1418_v55 = vpop.permute.xlu2 %1417 }
 0xd92   :  { %1438 = vmatpush.msrb.mxu3 %v1418_v55 }
 0xd93   :  { %1820 = vmatmul.msk.f32.vlgmr.msrb.gmra.mxu3 %vm317_vm1, %v1416_v1  ;;  %v1559_v2 = vpop.permute.xlu0 %1558 }
 0xd94   :  { %1828 = vmatpush.xpose.msk.msra.mxu0 %vm290_vm0, %v1559_v2  ;;  %1826 = vmatpush.msk.msra.mxu3 %vm423_vm2, %v812_v18 }
 0xd99   :  { %v1557_v52 = vpop.permute.xlu2 %1556 }
 0xd9b   :  { %v1648_v51 = vpop.permute.xlu0 %1647 }
 0xd9c   :  { %1833 = vmatpush.xpose.msk.msrb.mxu3 %vm290_vm0, %v1648_v51 }
 0xe0d   :  { %v1529_v4 = vpop.f32.mrf.mxu2 }
 0xe0e   :  { %1827 = vmatmul.msk.f32.vlgmr.msra.gmra.mxu3 %vm290_vm0, %v1529_v4 }
 0xe16   :  { %v1440_v6 = vpop.f32.mrf.mxu3  ;;  %1834 = vmatmul.msk.f32.vlgmr.msrb.gmra.mxu3 %vm290_vm0, %v1646_v5 }
 0xe17   :  { %1822 = vmatmul.msk.f32.vlgmr.msrb.gmra.mxu0 %vm290_vm0, %v1440_v6 }
 0xe1f   :  { %1829 = vmatmul.msk.f32.vlgmr.msra.gmra.mxu0 %vm290_vm0, %v1557_v52 }
 0xe91   :  { %v1552_v3 = vpop.f32.mrf.mxu3 }
 0xe94   :  { %v1463_v45 = vpop.f32.mrf.mxu0 }
 0xe95   :  { %v1466_v17 = vadd.f32 %v1463_v45, %v1377_v35 }
 0xe97   :  { %v1555_v7 = vadd.f32 %v1552_v3, %v1466_v17 }
 0xe99   :  { %v1670_v18 = vpop.f32.mrf.mxu3 }
 0xe9a   :  { %v1673_v58 = vsel %vm317_vm1, %v1670_v18, -inf }
 0xe9b   :  { %1674 = vmax.xlane.f32.xlu2 %v1673_v58 }
 0xe9c   :  { %v1581_v46 = vpop.f32.mrf.mxu0 }
 0xe9d   :  { %v1584_v8 = vsel %vm317_vm1, %v1581_v46, -inf }
 0xe9e   :  { %1585 = vmax.xlane.f32.xlu0 %v1584_v8 }
 0xeb3   :  { %1595 = vrot.lane.b32.xlu2 %v2415_v31, %s2139_s7 }
 0xf0e   :  { %v1675_v9 = vpop.xlane.xlu2 %1674 }
 0xf0f   :  { %v1676_v10 = vsub.f32 %v1670_v18, %v1675_v9 }
 0xf11   :  { %v1677_v11 = vmul.f32 1.442695, %v1676_v10  ;;  %v1586_v44 = vpop.xlane.xlu0 %1585 }
 0xf12   :  { %v1587_v12 = vsub.f32 %v1581_v46, %v1586_v44 }
 0xf13   :  { %1915 = vpow2.f32 %v1677_v11 }
 0xf14   :  { %v1588_v13 = vmul.f32 1.442695, %v1587_v12 }
 0xf16   :  { %1917 = vpow2.f32 %v1588_v13  ;;  %v1596_v14 = vpop.permute.xlu2 %1595 }
 0xf17   :  { %1616 = vmatpush.msra.mxu1 %v1596_v14 }
 0xf19   :  { %1836 = vmatpush.msk.msrb.mxu1 %vm423_vm2, %v996_v62  ;;  %v1916_v15 = vpop.eup %1915 }
 0xf1a   :  { %v1679_v16 = vsel %vm317_vm1, %v1916_v15, 0.0 }
 0xf1b   :  { %1680 = vadd.xlane.f32.xlu0 %v1679_v16 }
 0xf1c   :  { %v1918_v19 = vpop.eup %1917 }
 0xf1d   :  { %v1590_v20 = vsel %vm317_vm1, %v1918_v19, 0.0 }
 0xf1e   :  { %1591 = vadd.xlane.f32.xlu1 %v1590_v20 }
 0xf37   :  { %1684 = vrot.lane.b32.xlu1 %v2415_v31, %s2140_s17 }
 0xf8e   :  { %v1681_v57 = vpop.xlane.xlu0 %1680 }
 0xf91   :  { %v1592_v21 = vpop.xlane.xlu1 %1591 }
 0xf92   :  { %1919 = vrcp.f32 %v1592_v21 }
 0xf93   :  { %1921 = vrcp.f32 %v1681_v57 }
 0xf98   :  { %v1920_v22 = vpop.eup %1919 }
 0xf99   :  { %v1594_v23 = vmul.f32 %v1920_v22, %v1918_v19  ;;  %v1922_v62 = vpop.eup %1921 }
 0xf9a   :  { %v1683_v24 = vmul.f32 %v1922_v62, %v1916_v15 }
 0xf9b   :  { %1830 = vmatmul.msk.f32.vlgmr.msra.gmra.mxu1 %vm317_vm1, %v1594_v23 }
 0xfa9   :  { %v1685_v60 = vpop.permute.xlu1 %1684 }
 0xfaa   :  { %1705 = vmatpush.msrb.mxu0 %v1685_v60 }
 0xfab   :  { %1835 = vmatmul.msk.f32.vlgmr.msrb.gmra.mxu0 %vm317_vm1, %v1683_v24 }
0x1018   :  { %v1618_v25 = vpop.f32.mrf.mxu1 }
0x1019   :  { %1832 = vmatmul.msk.f32.vlgmr.msra.gmra.mxu2 %vm290_vm0, %v1618_v25 }
0x1028   :  { %v1707_v26 = vpop.f32.mrf.mxu0 }
0x1029   :  { %1837 = vmatmul.msk.f32.vlgmr.msrb.gmra.mxu1 %vm290_vm0, %v1707_v26 }
0x109c   :  { %v1641_v31 = vpop.f32.mrf.mxu2 }
0x109d   :  { %v1644_v29 = vadd.f32 %v1641_v31, %v1555_v7 }
0x10a6   :  { %v1730_v30 = vpop.f32.mrf.mxu1 }
0x10a7   :  { %v1733_v27 = vadd.f32 %v1730_v30, %v1644_v29 }
0x10a9   :  { %v1734_v28 = vadd.f32 %v2471_v53, %v1733_v27 }
0x10ab   :  { %1735 = vst [vmem:[#allocation14 + $0x8] sm:$0xff] %v1734_v28 }
0x10ac   :  { %1748 = dma.vmem_to_hbm [thread:$0]  %s1741_s0, 256, %s1743_s22, [#allocation4], %s2126_s25, %s2126_s25, %s2127_s26  }
0x10ad   :  { %2123 = dma.done.wait [#allocation4], 256  }
0x10ae   :  { %2124 = vsyncadd [#allocation4], 4294967040 }
0x10af   :  { %1753 = vsyncpa [#allocation3], 1 }
0x10b0   :  { %1754 = vsyncpa [#allocation6], 1 }
0x10b1   :  { %1755 = vsyncpa [#allocation9], 1 }
0x10b2   :  { %1756 = vsyncpa [#allocation12], 1 }
0x10b3   :  { %1757 = vsyncpa [#allocation4], 1 }

</bundles_post_ra>
